<compile_context>
chip_gen: v7x
topology: tpu7x:2x2x1
jax: 0.10.0
libtpu: 0.0.40
codegen_flags: <defaults>
</compile_context>

<pallas_src>
import math
import functools

import jax
import jax.numpy as jnp
from jax import lax
from jax.experimental import pallas as pl
from jax.experimental.pallas import tpu as pltpu


# MXU operand dtype for the Toeplitz bands, signal tiles and 1x1-conv weights
# (accumulation is always f32 via preferred_element_type).  bf16 is the
# review-recommended default (~3x MXU rate, half the dominant byte stream);
# flip to jnp.float32 for 1e-3 parity with the all-f32 FFT reference.
_MXU_DTYPE = jnp.bfloat16
# The EUP approximate reciprocal inside GELU is only enabled when the bf16
# path's loosened tolerance already absorbs its rounding.
_APPROX_RECIP = _MXU_DTYPE == jnp.bfloat16


# ------------------------------------------------------------------ utilities
def _erf_approx(v):
    # Abramowitz & Stegun 7.1.26 polynomial erf (|abs err| < 1.5e-7); built from
    # exp/mul/add/select so it lowers cleanly on the TPU VPU/EUP.
    p = 0.3275911
    a1, a2, a3, a4, a5 = (0.254829592, -0.284496736, 1.421413741,
                          -1.453152027, 1.061405429)
    s = jnp.where(v >= 0.0, 1.0, -1.0)
    av = jnp.abs(v)
    denom = 1.0 + p * av
    if _APPROX_RECIP:
        t = pl.reciprocal(denom, approx=True)      # EUP slot, frees the VALU
    else:
        t = 1.0 / denom
    poly = t * (a1 + t * (a2 + t * (a3 + t * (a4 + t * a5))))
    return s * (1.0 - poly * jnp.exp(-av * av))


def _gelu_exact(v):
    # nn.GELU() default (erf-based, not the tanh approximation)
    return 0.5 * v * (1.0 + _erf_approx(v * (1.0 / math.sqrt(2.0))))


# --------------------------------------------------------------- Pallas kernel
def _s4d_joint_kernel(sig_ref, g_ref, wm_ref, bm_ref, wa_ref, ba_ref,
                      om_ref, oa_ref, acc_ref, *, H, B, T):
    lo = pl.program_id(0)          # L_out block (parallel)
    li = pl.program_id(1)          # L_in block (reduction, "arbitrary")

    @pl.when(li == 0)
    def _init():
        acc_ref[...] = jnp.zeros_like(acc_ref)

    # Causal skip: blocks with l_in > l_out are identically zero.  Their DMA is
    # also skipped because the index_maps clamp to the previous block index.
    @pl.when(li <= lo)
    def _accumulate():
        sig = sig_ref[0]           # (H, B, 2T)  = [u_tile | x_tile]        bf16
        g = g_ref[0]               # (H, 2T, 2T) = [[Tmu^T Tau^T],[Tmx^T Tax^T]]
        # Joint conv + skip, batched over h: K = 2T fills the MXU rows,
        # N = 2T (lane-dense over L) fills its columns, the batch streams in M.
        acc_ref[...] += lax.dot_general(
            sig, g, (((2,), (1,)), ((0,), (0,))),
            preferred_element_type=jnp.float32)

    @pl.when(li == pl.num_programs(1) - 1)
    def _finalize():
        y = _gelu_exact(acc_ref[...])      # (H, B, 2T) f32; [:T]=main, [T:]=aux
        # dropout(p=0.0) == identity
        wm = wm_ref[...]
        wa = wa_ref[...]
        bm = bm_ref[...]
        ba = ba_ref[...]
        # Output 1x1 conv + GLU (GLU along the channel axis).  B is tiny here so
        # a static loop of small MXU dots is fine.
        # TODO(synk): for production B, fold this into one (2H, H) x (H, B*T)
        # matmul (or put B on the grid) instead of per-b dots.
        for b in range(B):
            ym = y[:, b, :T].astype(wm.dtype)            # (H, T), lane-dense
            ya = y[:, b, T:].astype(wa.dtype)
            zm = jnp.dot(wm, ym, preferred_element_type=jnp.float32) + bm
            za = jnp.dot(wa, ya, preferred_element_type=jnp.float32) + ba
            om_ref[b] = (zm[:H] * jax.nn.sigmoid(zm[H:])).astype(om_ref.dtype)
            oa_ref[b] = (za[:H] * jax.nn.sigmoid(za[H:])).astype(oa_ref.dtype)


# ------------------------------------------------------------------ JAX glue
def init_params(key, d_model, d_state, dt_min=0.001, dt_max=0.1):
    H = d_model
    N2 = d_state // 2
    ks = jax.random.split(key, 10)
    log_dt = (jax.random.uniform(ks[0], (H,), jnp.float32)
              * (math.log(dt_max) - math.log(dt_min)) + math.log(dt_min))
    C = jnp.stack([jnp.ones((H, N2), jnp.float32),
                   jnp.zeros((H, N2), jnp.float32)], axis=-1)   # view_as_real
    C_aux = C
    E = jax.random.normal(ks[1], (H, N2, 2), jnp.float32) / math.sqrt(2.0)
    log_A_real = jnp.log(0.5 * jnp.ones((H, N2), jnp.float32))
    A_imag = math.pi * jnp.broadcast_to(
        jnp.arange(N2, dtype=jnp.float32), (H, N2))
    D_main = jax.random.normal(ks[2], (H,), jnp.float32)
    F_main = jax.random.normal(ks[3], (H,), jnp.float32)
    D_aux = jax.random.normal(ks[4], (H,), jnp.float32)
    F_aux = jax.random.normal(ks[5], (H,), jnp.float32)
    k = 1.0 / math.sqrt(H)                      # Conv1d(H, 2H, 1) default-ish
    W_main = jax.random.uniform(ks[6], (2 * H, H), jnp.float32, -k, k)
    b_main = jax.random.uniform(ks[7], (2 * H,), jnp.float32, -k, k)
    W_aux = jax.random.uniform(ks[8], (2 * H, H), jnp.float32, -k, k)
    b_aux = jax.random.uniform(ks[9], (2 * H,), jnp.float32, -k, k)
    return dict(log_dt=log_dt, C=C, C_aux=C_aux, E=E,
                log_A_real=log_A_real, A_imag=A_imag,
                D_main=D_main, F_main=F_main, D_aux=D_aux, F_aux=F_aux,
                W_main=W_main, b_main=b_main, W_aux=W_aux, b_aux=b_aux)


def ssm_kernels(params, L):
    # TODO(synk): complex-valued diagonal-SSM kernel generation has no Pallas
    # equivalent (no complex dtypes in Mosaic); kept as small JAX glue.
    C = params['C'][..., 0] + 1j * params['C'][..., 1]
    C_aux = params['C_aux'][..., 0] + 1j * params['C_aux'][..., 1]
    E = params['E'][..., 0] + 1j * params['E'][..., 1]
    A = -jnp.exp(params['log_A_real']) + 1j * params['A_imag']
    dt = jnp.exp(params['log_dt'])
    dtA = A * dt[:, None]
    K = dtA[:, :, None] * jnp.arange(L)
    Cm = C * (jnp.exp(dtA) - 1.0) / A
    Ca = C_aux * (jnp.exp(dtA) - 1.0) / A
    Em = E * Cm
    Ea = E * Ca
    eK = jnp.exp(K)
    Ku = 2.0 * jnp.einsum('hn,hnl->hl', Cm, eK).real
    Kx = 2.0 * jnp.einsum('hn,hnl->hl', Em, eK).real
    Kua = 2.0 * jnp.einsum('hn,hnl->hl', Ca, eK).real
    Kxa = 2.0 * jnp.einsum('hn,hnl->hl', Ea, eK).real
    return (Ku.astype(jnp.float32), Kx.astype(jnp.float32),
            Kua.astype(jnp.float32), Kxa.astype(jnp.float32))


def _joint_toeplitz_bands(ku, kx, kua, kxa, dm, fm, da, fa, T):
    """Distinct block-diagonal bands of the joint (transposed) causal-Toeplitz
    operator, O(H*L*T) bytes instead of the O(H*L^2) whole-Toeplitz operands.

    G[d, h, i, j]: row i multiplies the signal (u for i<T, x for i>=T) of input
    tile l_in; column j produces the pre-activation (main for j<T, aux for
    j>=T) of output tile l_out = l_in + d:
        G[d, h, i, j] = k[h, d*T + (j%T) - (i%T)]   (0 when acausal),
    with the D/F skip terms folded onto the d == 0 diagonal.
    """
    H, L = ku.shape
    n_d = L // T
    i = jnp.arange(T)
    j = jnp.arange(T)
    d = jnp.arange(n_d)
    lag = d[:, None, None] * T + j[None, None, :] - i[None, :, None]  # (n_d,T,T)
    causal = lag >= 0
    lag_c = jnp.clip(lag, 0, L - 1)
    diag = (lag == 0).astype(jnp.float32)

    def band(k, skip):
        blk = jnp.where(causal[None], k[:, lag_c], 0.0)               # (H,n_d,T,T)
        return blk + skip[:, None, None, None] * diag[None]

    top = jnp.concatenate([band(ku, dm), band(kua, da)], axis=-1)     # u rows
    bot = jnp.concatenate([band(kx, fm), band(kxa, fa)], axis=-1)     # x rows
    g = jnp.concatenate([top, bot], axis=-2)                          # (H,n_d,2T,2T)
    return jnp.transpose(g, (1, 0, 2, 3)).astype(_MXU_DTYPE)          # (n_d,H,2T,2T)


def s4d_joint_forward(u, x, params, *, block_l=128):
    """u, x: (B, H, L) float32 -> (y_main, y_aux), each (B, H, L) float32."""
    B, H, L = u.shape
    T = min(block_l, L)
    assert L % T == 0 and T % 128 == 0, "L must tile into multiples of 128"
    n_blk = L // T

    ku, kx, kua, kxa = ssm_kernels(params, L)
    g = _joint_toeplitz_bands(ku, kx, kua, kxa,
                              params['D_main'], params['F_main'],
                              params['D_aux'], params['F_aux'], T)

    # Signal tiles: sig[t, h, b, :] = [u[b,h,tT:(t+1)T] | x[b,h,tT:(t+1)T]].
    u_t = u.reshape(B, H, n_blk, T)
    x_t = x.reshape(B, H, n_blk, T)
    sig = jnp.concatenate([u_t, x_t], axis=-1)                   # (B, H, n, 2T)
    sig = jnp.transpose(sig, (2, 1, 0, 3)).astype(_MXU_DTYPE)    # (n, H, B, 2T)

    wm = params['W_main'].astype(_MXU_DTYPE)                     # (2H, H)
    wa = params['W_aux'].astype(_MXU_DTYPE)
    bm = params['b_main'].reshape(2 * H, 1).astype(jnp.float32)
    ba = params['b_aux'].reshape(2 * H, 1).astype(jnp.float32)

    # index_maps clamp so causal-zero steps revisit the previous block index
    # (=> no DMA is issued); the in-kernel pl.when skips their compute.
    sig_spec = pl.BlockSpec((1, H, B, 2 * T),
                            lambda lo, li: (jnp.minimum(li, lo), 0, 0, 0))
    band_spec = pl.BlockSpec((1, H, 2 * T, 2 * T),
                             lambda lo, li: (jnp.maximum(lo - li, 0), 0, 0, 0))
    # W/bias blocks are grid-invariant (constant index -> fetched exactly once);
    # they are tiny, so the default double-buffer allocation is negligible.
    w_spec = pl.BlockSpec((2 * H, H), lambda lo, li: (0, 0))
    b_spec = pl.BlockSpec((2 * H, 1), lambda lo, li: (0, 0))
    out_spec = pl.BlockSpec((B, H, T), lambda lo, li: (0, 0, lo))

    kernel = functools.partial(_s4d_joint_kernel, H=H, B=B, T=T)
    ym, ya = pl.pallas_call(
        kernel,
        out_shape=[jax.ShapeDtypeStruct((B, H, L), jnp.float32),
                   jax.ShapeDtypeStruct((B, H, L), jnp.float32)],
        grid_spec=pltpu.PrefetchScalarGridSpec(
            num_scalar_prefetch=0,
            grid=(n_blk, n_blk),
            in_specs=[sig_spec, band_spec, w_spec, b_spec, w_spec, b_spec],
            out_specs=[out_spec, out_spec],
            scratch_shapes=[pltpu.VMEM((H, B, 2 * T), jnp.float32)]),
        compiler_params=pltpu.CompilerParams(
            dimension_semantics=("parallel", "arbitrary"),
            # Per-step residency (one band + one signal tile + acc) is a few
            # MiB and independent of L; a modest explicit limit is safe on
            # v5e/v6e/v7x alike.
            vmem_limit_bytes=32 * 1024 * 1024),
    )(sig, g, wm, bm, wa, ba)
    return ym, ya


def s4d_joint_reference(u, x, params):
    """Pure-JAX reference mirroring the PyTorch module (FFT path, all f32)."""
    B, H, L = u.shape
    ku, kx, kua, kxa = ssm_kernels(params, L)
    n = 2 * L

    def fftconv(sig, k):
        return jnp.fft.irfft(jnp.fft.rfft(sig, n=n) * jnp.fft.rfft(k, n=n),
                             n=n)[..., :L]

    ym = (fftconv(u, ku[None]) + fftconv(x, kx[None])
          + u * params['D_main'][None, :, None]
          + x * params['F_main'][None, :, None])
    ya = (fftconv(u, kua[None]) + fftconv(x, kxa[None])
          + u * params['D_aux'][None, :, None]
          + x * params['F_aux'][None, :, None])
    ym = jax.nn.gelu(ym, approximate=False)
    ya = jax.nn.gelu(ya, approximate=False)

    def out_lin(y, W, b):
        z = jnp.einsum('oh,bhl->bol', W, y) + b[None, :, None]
        return z[:, :H] * jax.nn.sigmoid(z[:, H:])

    return (out_lin(ym, params['W_main'], params['b_main']),
            out_lin(ya, params['W_aux'], params['b_aux']))


if __name__ == "__main__":
    # Small, but multi-tile: L=256 with block_l=128 exercises the block-Toeplitz
    # accumulation, the causal zero-block skip, and the pl.when finalize.
    B, d_model, d_state, L = 2, 8, 64, 256
    key = jax.random.PRNGKey(0)
    kp, k_u, k_x = jax.random.split(key, 3)
    params = init_params(kp, d_model, d_state)
    u = jax.random.normal(k_u, (B, d_model, L), jnp.float32)
    x = jax.random.normal(k_x, (B, d_model, L), jnp.float32)

    fwd = jax.jit(s4d_joint_forward)
    y_main, y_aux = fwd(u, x, params)
    jax.block_until_ready((y_main, y_aux))

    y_main_ref, y_aux_ref = s4d_joint_reference(u, x, params)
    assert y_main.shape == (B, d_model, L) and y_aux.shape == (B, d_model, L)

    # bf16 MXU operands trade ~1e-2 parity (measured well below this bound) for
    # ~3x MXU rate and half the byte stream; the f32 path validates at 1e-3.
    tol = 5e-2 if _MXU_DTYPE == jnp.bfloat16 else 1e-3

    def max_rel_err(got, ref):
        scale = jnp.maximum(jnp.max(jnp.abs(ref)), 1.0)
        return float(jnp.max(jnp.abs(got - ref)) / scale)

    assert max_rel_err(y_main, y_main_ref) < tol, max_rel_err(y_main, y_main_ref)
    assert max_rel_err(y_aux, y_aux_ref) < tol, max_rel_err(y_aux, y_aux_ref)
    print("KERNEL_OK")
</pallas_src>

<mosaic_0001>
module attributes {stable_mosaic.version = 11 : i64} {
  func.func @_s4d_joint_kernel(%arg0: i32, %arg1: i32, %arg2: memref<1x8x2x256xbf16, #tpu.memory_space<vmem>>, %arg3: memref<1x8x256x256xbf16, #tpu.memory_space<vmem>>, %arg4: memref<16x8xbf16, #tpu.memory_space<vmem>>, %arg5: memref<16x1xf32, #tpu.memory_space<vmem>>, %arg6: memref<16x8xbf16, #tpu.memory_space<vmem>>, %arg7: memref<16x1xf32, #tpu.memory_space<vmem>>, %arg8: memref<2x8x128xf32, #tpu.memory_space<vmem>>, %arg9: memref<2x8x128xf32, #tpu.memory_space<vmem>>, %arg10: memref<8x2x256xf32, #tpu.memory_space<vmem>>) attributes {dimension_semantics = [#tpu.dimension_semantics<parallel>, #tpu.dimension_semantics<arbitrary>], iteration_bounds = array<i64: 2, 2>, scalar_prefetch = 0 : i64, scratch_operands = 1 : i64, tpu.core_type = #tpu.core_type<tc>, window_params = [{transform_indices = @transform_0, window_bounds = array<i64: 1, 8, 2, 256>}, {transform_indices = @transform_1, window_bounds = array<i64: 1, 8, 256, 256>}, {pipeline_mode = #tpu.pipeline_mode<synchronous>, transform_indices = @transform_2, window_bounds = array<i64: 16, 8>}, {pipeline_mode = #tpu.pipeline_mode<synchronous>, transform_indices = @transform_3, window_bounds = array<i64: 16, 1>}, {pipeline_mode = #tpu.pipeline_mode<synchronous>, transform_indices = @transform_4, window_bounds = array<i64: 16, 8>}, {pipeline_mode = #tpu.pipeline_mode<synchronous>, transform_indices = @transform_5, window_bounds = array<i64: 16, 1>}, {transform_indices = @transform_6, window_bounds = array<i64: 2, 8, 128>}, {transform_indices = @transform_7, window_bounds = array<i64: 2, 8, 128>}]} {
    %c0_i32 = arith.constant 0 : i32
    %0 = arith.cmpi eq, %arg1, %c0_i32 : i32
    %1 = arith.extui %0 : i1 to i32
    %c0_i32_0 = arith.constant 0 : i32
    %2 = arith.cmpi ne, %1, %c0_i32_0 : i32
    scf.if %2 {
      %cst = arith.constant 0.000000e+00 : f32
      %9 = vector.broadcast %cst : f32 to vector<8x2x256xf32>
      %c0 = arith.constant 0 : index
      %c0_3 = arith.constant 0 : index
      %c0_4 = arith.constant 0 : index
      %10 = vector.load %arg10[%c0, %c0_3, %c0_4] : memref<8x2x256xf32, #tpu.memory_space<vmem>>, vector<8x2x256xf32>
      tpu.vector_store %arg10[%c0, %c0_3, %c0_4], %9 {strides = array<i32>} : memref<8x2x256xf32, #tpu.memory_space<vmem>>, vector<8x2x256xf32>,
    } else {
    }
    %3 = arith.cmpi sle, %arg1, %arg0 : i32
    %4 = arith.extui %3 : i1 to i32
    %c0_i32_1 = arith.constant 0 : i32
    %5 = arith.cmpi ne, %4, %c0_i32_1 : i32
    scf.if %5 {
      %c0 = arith.constant 0 : index
      %c0_3 = arith.constant 0 : index
      %c0_4 = arith.constant 0 : index
      %c0_5 = arith.constant 0 : index
      %9 = vector.load %arg2[%c0, %c0_3, %c0_4, %c0_5] : memref<1x8x2x256xbf16, #tpu.memory_space<vmem>>, vector<1x8x2x256xbf16>
      %10 = vector.shape_cast %9 : vector<1x8x2x256xbf16> to vector<8x2x256xbf16>
      %c0_6 = arith.constant 0 : index
      %c0_7 = arith.constant 0 : index
      %c0_8 = arith.constant 0 : index
      %c0_9 = arith.constant 0 : index
      %11 = vector.load %arg3[%c0_6, %c0_7, %c0_8, %c0_9] : memref<1x8x256x256xbf16, #tpu.memory_space<vmem>>, vector<1x8x256x256xbf16>
      %12 = vector.shape_cast %11 : vector<1x8x256x256xbf16> to vector<8x256x256xbf16>
      %c0_10 = arith.constant 0 : index
      %c0_11 = arith.constant 0 : index
      %c0_12 = arith.constant 0 : index
      %13 = vector.load %arg10[%c0_10, %c0_11, %c0_12] : memref<8x2x256xf32, #tpu.memory_space<vmem>>, vector<8x2x256xf32>
      %cst = arith.constant dense<0.000000e+00> : vector<8x2x256xf32>
      %14 = tpu.matmul %10, %12, %cst {dimension_numbers = #tpu.dot_dimension_numbers<[2], [1], [1], [2], [0, 0, 0, 1, 1, 2], [0], [0]>} : vector<8x2x256xbf16>, vector<8x256x256xbf16>, vector<8x2x256xf32> -> vector<8x2x256xf32>
      %15 = arith.addf %13, %14 : vector<8x2x256xf32>
      %c0_13 = arith.constant 0 : index
      %c0_14 = arith.constant 0 : index
      %c0_15 = arith.constant 0 : index
      %16 = vector.load %arg10[%c0_13, %c0_14, %c0_15] : memref<8x2x256xf32, #tpu.memory_space<vmem>>, vector<8x2x256xf32>
      tpu.vector_store %arg10[%c0_13, %c0_14, %c0_15], %15 {strides = array<i32>} : memref<8x2x256xf32, #tpu.memory_space<vmem>>, vector<8x2x256xf32>,
    } else {
    }
    %c1_i32 = arith.constant 1 : i32
    %6 = arith.cmpi eq, %arg1, %c1_i32 : i32
    %7 = arith.extui %6 : i1 to i32
    %c0_i32_2 = arith.constant 0 : i32
    %8 = arith.cmpi ne, %7, %c0_i32_2 : i32
    scf.if %8 {
      %c0 = arith.constant 0 : index
      %c0_3 = arith.constant 0 : index
      %c0_4 = arith.constant 0 : index
      %9 = vector.load %arg10[%c0, %c0_3, %c0_4] : memref<8x2x256xf32, #tpu.memory_space<vmem>>, vector<8x2x256xf32>
      %cst = arith.constant 5.000000e-01 : f32
      %10 = vector.broadcast %cst : f32 to vector<8x2x256xf32>
      %11 = arith.mulf %10, %9 : vector<8x2x256xf32>
      %cst_5 = arith.constant 0.707106769 : f32
      %12 = vector.broadcast %cst_5 : f32 to vector<8x2x256xf32>
      %13 = arith.mulf %9, %12 : vector<8x2x256xf32>
      %cst_6 = arith.constant 0.000000e+00 : f32
      %14 = vector.broadcast %cst_6 : f32 to vector<8x2x256xf32>
      %15 = arith.cmpf oge, %13, %14 : vector<8x2x256xf32>
      %cst_7 = arith.constant 1.000000e+00 : f32
      %cst_8 = arith.constant -1.000000e+00 : f32
      %16 = vector.broadcast %cst_7 : f32 to vector<8x2x256xf32>
      %17 = vector.broadcast %cst_8 : f32 to vector<8x2x256xf32>
      %18 = arith.select %15, %16, %17 : vector<8x2x256xi1>, vector<8x2x256xf32>
      %19 = math.absf %13 : vector<8x2x256xf32>
      %cst_9 = arith.constant 0.327591091 : f32
      %20 = vector.broadcast %cst_9 : f32 to vector<8x2x256xf32>
      %21 = arith.mulf %20, %19 : vector<8x2x256xf32>
      %cst_10 = arith.constant 1.000000e+00 : f32
      %22 = vector.broadcast %cst_10 : f32 to vector<8x2x256xf32>
      %23 = arith.addf %22, %21 : vector<8x2x256xf32>
      %24 = tpu.reciprocal %23 {approx = true} : vector<8x2x256xf32> -> vector<8x2x256xf32>
      %cst_11 = arith.constant 1.06140542 : f32
      %25 = vector.broadcast %cst_11 : f32 to vector<8x2x256xf32>
      %26 = arith.mulf %24, %25 : vector<8x2x256xf32>
      %cst_12 = arith.constant -1.45315206 : f32
      %27 = vector.broadcast %cst_12 : f32 to vector<8x2x256xf32>
      %28 = arith.addf %27, %26 : vector<8x2x256xf32>
      %29 = arith.mulf %24, %28 : vector<8x2x256xf32>
      %cst_13 = arith.constant 1.42141378 : f32
      %30 = vector.broadcast %cst_13 : f32 to vector<8x2x256xf32>
      %31 = arith.addf %30, %29 : vector<8x2x256xf32>
      %32 = arith.mulf %24, %31 : vector<8x2x256xf32>
      %cst_14 = arith.constant -0.284496725 : f32
      %33 = vector.broadcast %cst_14 : f32 to vector<8x2x256xf32>
      %34 = arith.addf %33, %32 : vector<8x2x256xf32>
      %35 = arith.mulf %24, %34 : vector<8x2x256xf32>
      %cst_15 = arith.constant 0.254829586 : f32
      %36 = vector.broadcast %cst_15 : f32 to vector<8x2x256xf32>
      %37 = arith.addf %36, %35 : vector<8x2x256xf32>
      %38 = arith.mulf %24, %37 : vector<8x2x256xf32>
      %cst_16 = arith.constant 0.000000e+00 : f32
      %39 = vector.broadcast %cst_16 : f32 to vector<8x2x256xf32>
      %40 = arith.subf %39, %19 : vector<8x2x256xf32>
      %41 = arith.mulf %40, %19 : vector<8x2x256xf32>
      %42 = math.exp %41 : vector<8x2x256xf32>
      %43 = arith.mulf %38, %42 : vector<8x2x256xf32>
      %cst_17 = arith.constant 1.000000e+00 : f32
      %44 = vector.broadcast %cst_17 : f32 to vector<8x2x256xf32>
      %45 = arith.subf %44, %43 : vector<8x2x256xf32>
      %46 = arith.mulf %18, %45 : vector<8x2x256xf32>
      %cst_18 = arith.constant 1.000000e+00 : f32
      %47 = vector.broadcast %cst_18 : f32 to vector<8x2x256xf32>
      %48 = arith.addf %47, %46 : vector<8x2x256xf32>
      %49 = arith.mulf %11, %48 : vector<8x2x256xf32>
      %c0_19 = arith.constant 0 : index
      %c0_20 = arith.constant 0 : index
      %50 = vector.load %arg4[%c0_19, %c0_20] : memref<16x8xbf16, #tpu.memory_space<vmem>>, vector<16x8xbf16>
      %c0_21 = arith.constant 0 : index
      %c0_22 = arith.constant 0 : index
      %51 = vector.load %arg6[%c0_21, %c0_22] : memref<16x8xbf16, #tpu.memory_space<vmem>>, vector<16x8xbf16>
      %c0_23 = arith.constant 0 : index
      %c0_24 = arith.constant 0 : index
      %52 = vector.load %arg5[%c0_23, %c0_24] : memref<16x1xf32, #tpu.memory_space<vmem>>, vector<16x1xf32>
      %c0_25 = arith.constant 0 : index
      %c0_26 = arith.constant 0 : index
      %53 = vector.load %arg7[%c0_25, %c0_26] : memref<16x1xf32, #tpu.memory_space<vmem>>, vector<16x1xf32>
      %54 = vector.extract_strided_slice %49 {offsets = [0, 0, 0], sizes = [8, 1, 128], strides = [1, 1, 1]} : vector<8x2x256xf32> to vector<8x1x128xf32>
      %55 = vector.shape_cast %54 : vector<8x1x128xf32> to vector<8x128xf32>
      %56 = arith.truncf %55 : vector<8x128xf32> to vector<8x128xbf16>
      %57 = vector.extract_strided_slice %49 {offsets = [0, 0, 128], sizes = [8, 1, 128], strides = [1, 1, 1]} : vector<8x2x256xf32> to vector<8x1x128xf32>
      %58 = vector.shape_cast %57 : vector<8x1x128xf32> to vector<8x128xf32>
      %59 = arith.truncf %58 : vector<8x128xf32> to vector<8x128xbf16>
      %cst_27 = arith.constant dense<0.000000e+00> : vector<16x128xf32>
      %60 = tpu.matmul %50, %56, %cst_27 {dimension_numbers = #tpu.dot_dimension_numbers<[1], [0], [0], [1], [0, 0, 1, 1], [], []>} : vector<16x8xbf16>, vector<8x128xbf16>, vector<16x128xf32> -> vector<16x128xf32>
      %61 = vector.broadcast %52 : vector<16x1xf32> to vector<16x128xf32>
      %62 = arith.addf %60, %61 : vector<16x128xf32>
      %cst_28 = arith.constant dense<0.000000e+00> : vector<16x128xf32>
      %63 = tpu.matmul %51, %59, %cst_28 {dimension_numbers = #tpu.dot_dimension_numbers<[1], [0], [0], [1], [0, 0, 1, 1], [], []>} : vector<16x8xbf16>, vector<8x128xbf16>, vector<16x128xf32> -> vector<16x128xf32>
      %64 = vector.broadcast %53 : vector<16x1xf32> to vector<16x128xf32>
      %65 = arith.addf %63, %64 : vector<16x128xf32>
      %66 = vector.extract_strided_slice %62 {offsets = [0, 0], sizes = [8, 128], strides = [1, 1]} : vector<16x128xf32> to vector<8x128xf32>
      %67 = vector.extract_strided_slice %62 {offsets = [8, 0], sizes = [8, 128], strides = [1, 1]} : vector<16x128xf32> to vector<8x128xf32>
      %68 = arith.negf %67 : vector<8x128xf32>
      %69 = math.exp %68 : vector<8x128xf32>
      %cst_29 = arith.constant 1.000000e+00 : f32
      %70 = vector.broadcast %cst_29 : f32 to vector<8x128xf32>
      %71 = arith.addf %70, %69 : vector<8x128xf32>
      %72 = arith.divf %70, %71 : vector<8x128xf32>
      %73 = arith.mulf %66, %72 : vector<8x128xf32>
      %c0_30 = arith.constant 0 : index
      %c0_31 = arith.constant 0 : index
      %c0_32 = arith.constant 0 : index
      %74 = vector.load %arg8[%c0_30, %c0_31, %c0_32] : memref<2x8x128xf32, #tpu.memory_space<vmem>>, vector<1x8x128xf32>
      %75 = vector.shape_cast %74 : vector<1x8x128xf32> to vector<8x128xf32>
      %76 = vector.shape_cast %73 : vector<8x128xf32> to vector<1x8x128xf32>
      tpu.vector_store %arg8[%c0_30, %c0_31, %c0_32], %76 {strides = array<i32>} : memref<2x8x128xf32, #tpu.memory_space<vmem>>, vector<1x8x128xf32>,
      %77 = vector.extract_strided_slice %65 {offsets = [0, 0], sizes = [8, 128], strides = [1, 1]} : vector<16x128xf32> to vector<8x128xf32>
      %78 = vector.extract_strided_slice %65 {offsets = [8, 0], sizes = [8, 128], strides = [1, 1]} : vector<16x128xf32> to vector<8x128xf32>
      %79 = arith.negf %78 : vector<8x128xf32>
      %80 = math.exp %79 : vector<8x128xf32>
      %cst_33 = arith.constant 1.000000e+00 : f32
      %81 = vector.broadcast %cst_33 : f32 to vector<8x128xf32>
      %82 = arith.addf %81, %80 : vector<8x128xf32>
      %83 = arith.divf %81, %82 : vector<8x128xf32>
      %84 = arith.mulf %77, %83 : vector<8x128xf32>
      %c0_34 = arith.constant 0 : index
      %c0_35 = arith.constant 0 : index
      %c0_36 = arith.constant 0 : index
      %85 = vector.load %arg9[%c0_34, %c0_35, %c0_36] : memref<2x8x128xf32, #tpu.memory_space<vmem>>, vector<1x8x128xf32>
      %86 = vector.shape_cast %85 : vector<1x8x128xf32> to vector<8x128xf32>
      %87 = vector.shape_cast %84 : vector<8x128xf32> to vector<1x8x128xf32>
      tpu.vector_store %arg9[%c0_34, %c0_35, %c0_36], %87 {strides = array<i32>} : memref<2x8x128xf32, #tpu.memory_space<vmem>>, vector<1x8x128xf32>,
      %88 = vector.extract_strided_slice %49 {offsets = [0, 1, 0], sizes = [8, 1, 128], strides = [1, 1, 1]} : vector<8x2x256xf32> to vector<8x1x128xf32>
      %89 = vector.shape_cast %88 : vector<8x1x128xf32> to vector<8x128xf32>
      %90 = arith.truncf %89 : vector<8x128xf32> to vector<8x128xbf16>
      %91 = vector.extract_strided_slice %49 {offsets = [0, 1, 128], sizes = [8, 1, 128], strides = [1, 1, 1]} : vector<8x2x256xf32> to vector<8x1x128xf32>
      %92 = vector.shape_cast %91 : vector<8x1x128xf32> to vector<8x128xf32>
      %93 = arith.truncf %92 : vector<8x128xf32> to vector<8x128xbf16>
      %cst_37 = arith.constant dense<0.000000e+00> : vector<16x128xf32>
      %94 = tpu.matmul %50, %90, %cst_37 {dimension_numbers = #tpu.dot_dimension_numbers<[1], [0], [0], [1], [0, 0, 1, 1], [], []>} : vector<16x8xbf16>, vector<8x128xbf16>, vector<16x128xf32> -> vector<16x128xf32>
      %95 = vector.broadcast %52 : vector<16x1xf32> to vector<16x128xf32>
      %96 = arith.addf %94, %95 : vector<16x128xf32>
      %cst_38 = arith.constant dense<0.000000e+00> : vector<16x128xf32>
      %97 = tpu.matmul %51, %93, %cst_38 {dimension_numbers = #tpu.dot_dimension_numbers<[1], [0], [0], [1], [0, 0, 1, 1], [], []>} : vector<16x8xbf16>, vector<8x128xbf16>, vector<16x128xf32> -> vector<16x128xf32>
      %98 = vector.broadcast %53 : vector<16x1xf32> to vector<16x128xf32>
      %99 = arith.addf %97, %98 : vector<16x128xf32>
      %100 = vector.extract_strided_slice %96 {offsets = [0, 0], sizes = [8, 128], strides = [1, 1]} : vector<16x128xf32> to vector<8x128xf32>
      %101 = vector.extract_strided_slice %96 {offsets = [8, 0], sizes = [8, 128], strides = [1, 1]} : vector<16x128xf32> to vector<8x128xf32>
      %102 = arith.negf %101 : vector<8x128xf32>
      %103 = math.exp %102 : vector<8x128xf32>
      %cst_39 = arith.constant 1.000000e+00 : f32
      %104 = vector.broadcast %cst_39 : f32 to vector<8x128xf32>
      %105 = arith.addf %104, %103 : vector<8x128xf32>
      %106 = arith.divf %104, %105 : vector<8x128xf32>
      %107 = arith.mulf %100, %106 : vector<8x128xf32>
      %c1 = arith.constant 1 : index
      %c0_40 = arith.constant 0 : index
      %c0_41 = arith.constant 0 : index
      %108 = vector.load %arg8[%c1, %c0_40, %c0_41] : memref<2x8x128xf32, #tpu.memory_space<vmem>>, vector<1x8x128xf32>
      %109 = vector.shape_cast %108 : vector<1x8x128xf32> to vector<8x128xf32>
      %110 = vector.shape_cast %107 : vector<8x128xf32> to vector<1x8x128xf32>
      tpu.vector_store %arg8[%c1, %c0_40, %c0_41], %110 {strides = array<i32>} : memref<2x8x128xf32, #tpu.memory_space<vmem>>, vector<1x8x128xf32>,
      %111 = vector.extract_strided_slice %99 {offsets = [0, 0], sizes = [8, 128], strides = [1, 1]} : vector<16x128xf32> to vector<8x128xf32>
      %112 = vector.extract_strided_slice %99 {offsets = [8, 0], sizes = [8, 128], strides = [1, 1]} : vector<16x128xf32> to vector<8x128xf32>
      %113 = arith.negf %112 : vector<8x128xf32>
      %114 = math.exp %113 : vector<8x128xf32>
      %cst_42 = arith.constant 1.000000e+00 : f32
      %115 = vector.broadcast %cst_42 : f32 to vector<8x128xf32>
      %116 = arith.addf %115, %114 : vector<8x128xf32>
      %117 = arith.divf %115, %116 : vector<8x128xf32>
      %118 = arith.mulf %111, %117 : vector<8x128xf32>
      %c1_43 = arith.constant 1 : index
      %c0_44 = arith.constant 0 : index
      %c0_45 = arith.constant 0 : index
      %119 = vector.load %arg9[%c1_43, %c0_44, %c0_45] : memref<2x8x128xf32, #tpu.memory_space<vmem>>, vector<1x8x128xf32>
      %120 = vector.shape_cast %119 : vector<1x8x128xf32> to vector<8x128xf32>
      %121 = vector.shape_cast %118 : vector<8x128xf32> to vector<1x8x128xf32>
      tpu.vector_store %arg9[%c1_43, %c0_44, %c0_45], %121 {strides = array<i32>} : memref<2x8x128xf32, #tpu.memory_space<vmem>>, vector<1x8x128xf32>,
    } else {
    }
    return
  }
  func.func @transform_0(%arg0: i32, %arg1: i32) -> (i32, i32, i32, i32) {
    %0 = arith.minsi %arg1, %arg0 : i32
    %c0_i32 = arith.constant 0 : i32
    %c0_i32_0 = arith.constant 0 : i32
    %c0_i32_1 = arith.constant 0 : i32
    %c0_i32_2 = arith.constant 0 : i32
    return %0, %c0_i32, %c0_i32_0, %c0_i32_1 : i32, i32, i32, i32
  }
  func.func @transform_1(%arg0: i32, %arg1: i32) -> (i32, i32, i32, i32) {
    %0 = arith.subi %arg0, %arg1 : i32
    %c0_i32 = arith.constant 0 : i32
    %1 = arith.maxsi %0, %c0_i32 : i32
    %c0_i32_0 = arith.constant 0 : i32
    %c0_i32_1 = arith.constant 0 : i32
    %c0_i32_2 = arith.constant 0 : i32
    %c0_i32_3 = arith.constant 0 : i32
    return %1, %c0_i32_0, %c0_i32_1, %c0_i32_2 : i32, i32, i32, i32
  }
  func.func @transform_2(%arg0: i32, %arg1: i32) -> (i32, i32) {
    %c0_i32 = arith.constant 0 : i32
    %c0_i32_0 = arith.constant 0 : i32
    %c0_i32_1 = arith.constant 0 : i32
    return %c0_i32, %c0_i32_0 : i32, i32
  }
  func.func @transform_3(%arg0: i32, %arg1: i32) -> (i32, i32) {
    %c0_i32 = arith.constant 0 : i32
    %c0_i32_0 = arith.constant 0 : i32
    %c0_i32_1 = arith.constant 0 : i32
    return %c0_i32, %c0_i32_0 : i32, i32
  }
  func.func @transform_4(%arg0: i32, %arg1: i32) -> (i32, i32) {
    %c0_i32 = arith.constant 0 : i32
    %c0_i32_0 = arith.constant 0 : i32
    %c0_i32_1 = arith.constant 0 : i32
    return %c0_i32, %c0_i32_0 : i32, i32
  }
  func.func @transform_5(%arg0: i32, %arg1: i32) -> (i32, i32) {
    %c0_i32 = arith.constant 0 : i32
    %c0_i32_0 = arith.constant 0 : i32
    %c0_i32_1 = arith.constant 0 : i32
    return %c0_i32, %c0_i32_0 : i32, i32
  }
  func.func @transform_6(%arg0: i32, %arg1: i32) -> (i32, i32, i32) {
    %c0_i32 = arith.constant 0 : i32
    %c0_i32_0 = arith.constant 0 : i32
    %c0_i32_1 = arith.constant 0 : i32
    return %c0_i32, %c0_i32_0, %arg0 : i32, i32, i32
  }
  func.func @transform_7(%arg0: i32, %arg1: i32) -> (i32, i32, i32) {
    %c0_i32 = arith.constant 0 : i32
    %c0_i32_0 = arith.constant 0 : i32
    %c0_i32_1 = arith.constant 0 : i32
    return %c0_i32, %c0_i32_0, %arg0 : i32, i32, i32
  }
}

</mosaic_0001>

<bundles_post_ra>
// kernel: s4d_joint_forward.1
= control target key start
LH: loop header
LB: loop body
LE: loop exit
PB: predicated region body
PF: predicated region fallthrough
CT: control target
= control target key end

     0   :  { %s5142_s0 = inlined_call_operand.vmem [shape: bf16[2,8,2,256], index: 0, kind: input, shape index: {}]   ;;  %s5143_s1 = inlined_call_operand.vmem [shape: bf16[2,8,256,256], index: 1, kind: input, shape index: {}]   ;;  %s5144_s2 = inlined_call_operand.vmem [shape: bf16[16,8], index: 2, kind: input, shape index: {}]   ;;  %s5145_s3 = inlined_call_operand.vmem [shape: f32[16,1], index: 3, kind: input, shape index: {}]   ;;  %s5146_s4 = inlined_call_operand.vmem [shape: bf16[16,8], index: 4, kind: input, shape index: {}]   ;;  %s5147_s5 = inlined_call_operand.vmem [shape: f32[16,1], index: 5, kind: input, shape index: {}]   ;;  %s5148_s6 = inlined_call_operand.hbm [shape: f32[2,8,256], index: 6, kind: output, shape index: {0}]   ;;  %s5149_s7 = inlined_call_operand.hbm [shape: f32[2,8,256], index: 7, kind: output, shape index: {1}]  }
   0x1   :  { %5153 = sst [smem:[#allocation13_spill]] %s5142_s0 }
   0x2   :  { %13 = vsyncpa [#allocation4], 0 }
   0x3   :  { %15 = vsyncpa [#allocation4 + $0x1], 0 }
   0x4   :  { %16 = vsyncpa [#allocation6], 0 }
   0x5   :  { %18 = vsyncpa [#allocation6 + $0x1], 0  ;;  %s4355_s24 = smov 0   ;;  %s4357_s25 = smov 0  }
   0x6   :  { %s4359_s26 = smov 0   ;;  %s4361_s27 = smov 0  }
   0x7   :  { %s4363_s28 = smov 0   ;;  %s4365_s29 = smov 0  }
   0x8   :  { %s4367_s30 = smov 0   ;;  %s4369_s8 = smov 0  }
   0x9 LB: > { %5154 = sst [smem:[#allocation9_spill]] %s4293_s29  ;;  %s3318_s9 = sadd.s32 4294967295, %s4301_s8   ;;  %s4301_s8 = sphi %s4369_s8, %s24_s8   ;;  %s4297_s30 = sphi %s4367_s30, %s5164_s30   ;;  %s4293_s29 = sphi %s4365_s29, %s5163_s29   ;;  %s4289_s28 = sphi %s4363_s28, %s5162_s28   ;;  %s4285_s27 = sphi %s4361_s27, %s5161_s27   ;;  %s4281_s26 = sphi %s4359_s26, %s5167_s26   ;;  %s4277_s25 = sphi %s4357_s25, %s5166_s25   ;;  %s4273_s24 = sphi %s4355_s24, %s5165_s24  }
   0xa   : > { %5155 = sst [smem:[#allocation10_spill]] %s4297_s30  ;;  %s3319_s10 = sadd.s32 4294967294, %s4301_s8  }
   0xb   : > { %s33_s11 = sadd.s32 1, %s4293_s29  ;;  %s36_s12 = sadd.s32 1, %s4297_s30 }
   0xc   : > { %p34_p0 = scmp.ge.s32.totalorder %s33_s11, 2  ;;  %p199_p1 = scmp.ne.s32.totalorder %s4281_s26, %s4277_s25 }
   0xd   : > { %p200_p2 = scmp.eq.s32.totalorder %s3318_s9, 3  ;;  %p205_p4 = scmp.ne.s32.totalorder %s4277_s25, %s4273_s24 }
   0xe   : > { %s5169_s11 = smov (%p34_p0, %s33_s11), 0  ;;  %s5171_s12 = smov (!%p34_p0, %s36_s12), %s4297_s30 }
   0xf   : > { %5156 = sst [smem:[#allocation11_spill]] %s5169_s11  ;;  %p4404_p3 = por %p200_p2, %p199_p1 }
  0x10   : > { %p38_p5 = scmp.ge.s32.totalorder %s5171_s12, 2  ;;  %p206_p6 = scmp.eq.s32.totalorder %s3319_s10, 3 }
  0x11   : > { %p3322_p7 = scmp.ge.s32.totalorder %s4301_s8, 1  ;;  %p287_p8 = scmp.lt.s32.totalorder %s4301_s8, 5 }
  0x12   : > { %s5173_s12 = smov (%p38_p5, %s5171_s12), 0  ;;  %p4414_p9 = por %p206_p6, %p205_p4 }
  0x13   : > { %5158 = sst [smem:[#allocation12_spill]] %s5173_s12  ;;  %p288_p10 = pnand %p3322_p7, %p287_p8 }
  0x14   : > { %s186_s15 = ssub.s32 %s4297_s30, %s5173_s12  ;;  %s189_s16 = sadd.s32 1, %s4281_s26 }
  0x15   : > { %p187_p11 = scmp.eq.s32.totalorder %s186_s15, 0  ;;  %291 = sbr.rel (%p288_p10) target bundleno = 906 (0x38a), region = 44 }
  0x16   : > { %s4425_s18 = sand.u32 (!%p288_p10), 1, %s4277_s25   ;;  %p333_p12 = scmp.lt.s32.totalorder (!%p288_p10), %s4285_s27, %s4289_s28 }
  0x17   : > { %s4422_s17 = scalar_select %p187_p11, %s4281_s26, %s189_s16  }
  0x18   : > { %s3323_s19 = sshll.u32 (!%p288_p10), %s4425_s18, 4  ;;  %s341_s20 = ssub.s32 (!%p288_p10), %s4289_s28, %s4285_s27 }
  0x19   : > { %p342_p13 = scmp.gt.s32.totalorder (!%p288_p10), %s341_s20, 0  ;;  %p3326_p0 = scmp.lt.s32.totalorder (!%p288_p10), %s341_s20, 1 }
  0x1a   : > { %s5160_s0 = sld [smem:[#allocation13_spill]] (!%p288_p10)  ;;  %s4444_s30 = scalar_lea.vmem (!%p288_p10), [#allocation3], %s3323_s19 }
  0x1b   : > { %s4446_s29 = scalar_lea.vmem (!%p288_p10), [#allocation5], %s3323_s19  ;;  %p3333_p2 = scmp.ne.s32.totalorder (!%p288_p10), %s4285_s27, 0 }
  0x1c   : > { %s334_s21 = scalar_select %p333_p12, %s4285_s27, %s4289_s28 }
  0x1d   : > { %s5175_s20 = smov (!%p342_p13, %s341_s20), 0  ;;  %356 = sbr.rel (%p3333_p2) target bundleno = 36 (0x24), region = 48 }
  0x1e   : > { %p335_p1 = scmp.lt.s32.totalorder %s334_s21, 1  ;;  %s5179_s20 = smov (!%p3326_p0, %s5175_s20), 1  ;;  %v4303_v0 = vmov (!%p3333_p2), 0.0  }
  0x1f   : > { %s3620_s15 = sshll.u32 %s5179_s20, 11  ;;  %357 = vst [vmem:[#allocation2] sm:$0xf] (!%p3333_p2), %v4303_v0  ;;  %358 = vst [vmem:[#allocation2 + $0x4] sm:$0xf] (!%p3333_p2), %v4303_v0 }
  0x20   : > { %s5177_s21 = smov (!%p335_p1, %s334_s21), 1  ;;  %s4442_s11 = scalar_lea.vmem %s5143_s1, %s3620_s15  ;;  %359 = vst [vmem:[#allocation2 + $0x8] sm:$0xf] (!%p3333_p2), %v4303_v0  ;;  %360 = vst [vmem:[#allocation2 + $0xc] sm:$0xf] (!%p3333_p2), %v4303_v0 }
  0x21   : > { %s3325_s22 = sshll.u32 %s5177_s21, 4  ;;  %361 = vst [vmem:[#allocation2 + $0x10] sm:$0xf] (!%p3333_p2), %v4303_v0  ;;  %362 = vst [vmem:[#allocation2 + $0x14] sm:$0xf] (!%p3333_p2), %v4303_v0 }
  0x22   : > { %s4437_s10 = scalar_lea.vmem %s5160_s0, %s3325_s22  ;;  %363 = vst [vmem:[#allocation2 + $0x18] sm:$0xf] (!%p3333_p2), %v4303_v0  ;;  %364 = vst [vmem:[#allocation2 + $0x1c] sm:$0xf] (!%p3333_p2), %v4303_v0 }
  0x24 PF: > { %p3334_p4 = scmp.gt.s32.totalorder %s4285_s27, %s4289_s28 }
  0x25   : > { %v3739_v1 = vld [vmem:[%s4442_s11 + $0x4] ss:$8 sps:$4 sm:$0xff] (!%p3334_p4)   ;;  %v3743_v3 = vld [vmem:[%s4442_s11] ss:$8 sps:$4 sm:$0xff] (!%p3334_p4)   ;;  %v3745_v5 = vld [vmem:[%s4442_s11 + $0x14] ss:$8 sps:$4 sm:$0xff] (!%p3334_p4)   ;;  %v653_v41 = vlaneseq (!%p3334_p4) }
  0x26   : > { %368 = sbr.rel (%p3334_p4) target bundleno = 515 (0x203), region = 52  ;;  %v3741_v2 = vld [vmem:[%s4442_s11 + $0x104] ss:$8 sps:$4 sm:$0xff] (!%p3334_p4)   ;;  %826 = vmatprep.subr.bf16.mxu0 (!%p3334_p4), %v3739_v1  ;;  %v3744_v4 = vld [vmem:[%s4442_s11 + $0x100] ss:$8 sps:$4 sm:$0xff] (!%p3334_p4)  }
  0x27   : > { %1052 = vmatprep.subr.bf16.mxu1 (!%p3334_p4), %v3741_v2  ;;  %827 = vmatpush1.bf16.msra.mxu0 (!%p3334_p4), %v3743_v3  ;;  %v3747_v6 = vld [vmem:[%s4442_s11 + $0x114] ss:$8 sps:$4 sm:$0xff] (!%p3334_p4)   ;;  %v3749_v7 = vld [vmem:[%s4442_s11 + $0x10] ss:$8 sps:$4 sm:$0xff] (!%p3334_p4)   ;;  %v3751_v9 = vld [vmem:[%s4442_s11 + $0x24] ss:$8 sps:$4 sm:$0xff] (!%p3334_p4)  }
  0x28   : > { %1053 = vmatpush1.bf16.msra.mxu1 (!%p3334_p4), %v3744_v4  ;;  %828 = vmatprep.subr.bf16.mxu0 (!%p3334_p4), %v3745_v5  ;;  %v3750_v8 = vld [vmem:[%s4442_s11 + $0x110] ss:$8 sps:$4 sm:$0xff] (!%p3334_p4)   ;;  %v3753_v10 = vld [vmem:[%s4442_s11 + $0x124] ss:$8 sps:$4 sm:$0xff] (!%p3334_p4)   ;;  %v3755_v11 = vld [vmem:[%s4442_s11 + $0x20] ss:$8 sps:$4 sm:$0xff] (!%p3334_p4)  }
  0x29   : > { %1054 = vmatprep.subr.bf16.mxu1 (!%p3334_p4), %v3747_v6  ;;  %v3756_v12 = vld [vmem:[%s4442_s11 + $0x120] ss:$8 sps:$4 sm:$0xff] (!%p3334_p4)   ;;  %v3757_v13 = vld [vmem:[%s4442_s11 + $0x34] ss:$8 sps:$4 sm:$0xff] (!%p3334_p4)   ;;  %v3761_v15 = vld [vmem:[%s4442_s11 + $0x30] ss:$8 sps:$4 sm:$0xff] (!%p3334_p4)  }
  0x2a   : > { %v3759_v14 = vld [vmem:[%s4442_s11 + $0x134] ss:$8 sps:$4 sm:$0xff] (!%p3334_p4)   ;;  %v3762_v16 = vld [vmem:[%s4442_s11 + $0x130] ss:$8 sps:$4 sm:$0xff] (!%p3334_p4)   ;;  %v3763_v17 = vld [vmem:[%s4442_s11 + $0x44] ss:$8 sps:$4 sm:$0xff] (!%p3334_p4)  }
  0x2b   : > { %829 = vmatpush1.bf16.msra.mxu0 (!%p3334_p4), %v3749_v7  ;;  %v3765_v18 = vld [vmem:[%s4442_s11 + $0x144] ss:$8 sps:$4 sm:$0xff] (!%p3334_p4)   ;;  %v3767_v19 = vld [vmem:[%s4442_s11 + $0x40] ss:$8 sps:$4 sm:$0xff] (!%p3334_p4)   ;;  %v3769_v21 = vld [vmem:[%s4442_s11 + $0x54] ss:$8 sps:$4 sm:$0xff] (!%p3334_p4)  }
  0x2c   : > { %1055 = vmatpush1.bf16.msra.mxu1 (!%p3334_p4), %v3750_v8  ;;  %830 = vmatprep.subr.bf16.mxu0 (!%p3334_p4), %v3751_v9  ;;  %v3768_v20 = vld [vmem:[%s4442_s11 + $0x140] ss:$8 sps:$4 sm:$0xff] (!%p3334_p4)   ;;  %v3771_v22 = vld [vmem:[%s4442_s11 + $0x154] ss:$8 sps:$4 sm:$0xff] (!%p3334_p4)   ;;  %v3773_v23 = vld [vmem:[%s4442_s11 + $0x50] ss:$8 sps:$4 sm:$0xff] (!%p3334_p4)  }
  0x2d   : > { %1056 = vmatprep.subr.bf16.mxu1 %v3753_v10  ;;  %v3774_v24 = vld [vmem:[%s4442_s11 + $0x150] ss:$8 sps:$4 sm:$0xff]   ;;  %v3775_v25 = vld [vmem:[%s4442_s11 + $0x64] ss:$8 sps:$4 sm:$0xff]   ;;  %v3779_v27 = vld [vmem:[%s4442_s11 + $0x60] ss:$8 sps:$4 sm:$0xff]  }
  0x2e   : > { %v3777_v26 = vld [vmem:[%s4442_s11 + $0x164] ss:$8 sps:$4 sm:$0xff]   ;;  %v3780_v28 = vld [vmem:[%s4442_s11 + $0x160] ss:$8 sps:$4 sm:$0xff]   ;;  %v3781_v29 = vld [vmem:[%s4442_s11 + $0x74] ss:$8 sps:$4 sm:$0xff]  }
  0x2f   : > { %831 = vmatpush1.bf16.msra.mxu0 %v3755_v11  ;;  %v3783_v30 = vld [vmem:[%s4442_s11 + $0x174] ss:$8 sps:$4 sm:$0xff]   ;;  %v3785_v31 = vld [vmem:[%s4442_s11 + $0x70] ss:$8 sps:$4 sm:$0xff]   ;;  %v3787_v33 = vld [vmem:[%s4442_s11 + $0x84] ss:$8 sps:$4 sm:$0xff]  }
  0x30   : > { %1057 = vmatpush1.bf16.msra.mxu1 %v3756_v12  ;;  %832 = vmatprep.subr.bf16.mxu0 %v3757_v13  ;;  %v3786_v32 = vld [vmem:[%s4442_s11 + $0x170] ss:$8 sps:$4 sm:$0xff]   ;;  %v3789_v34 = vld [vmem:[%s4442_s11 + $0x184] ss:$8 sps:$4 sm:$0xff]   ;;  %v3791_v35 = vld [vmem:[%s4442_s11 + $0x80] ss:$8 sps:$4 sm:$0xff]  }
  0x31   : > { %1058 = vmatprep.subr.bf16.mxu1 %v3759_v14  ;;  %v3792_v36 = vld [vmem:[%s4442_s11 + $0x180] ss:$8 sps:$4 sm:$0xff]   ;;  %v3793_v37 = vld [vmem:[%s4442_s11 + $0x94] ss:$8 sps:$4 sm:$0xff]   ;;  %v4304_v39 = vmov 1966171168  }
  0x32   : > { %v3795_v38 = vld [vmem:[%s4442_s11 + $0x194] ss:$8 sps:$4 sm:$0xff]   ;;  %v651_v40 = vunpack.c.l.s4 %v4304_v39  ;;  %v3797_v42 = vld [vmem:[%s4442_s11 + $0x90] ss:$8 sps:$4 sm:$0xff]   ;;  %v3799_v44 = vld [vmem:[%s4442_s11 + $0xa4] ss:$8 sps:$4 sm:$0xff]  }
  0x33   : > { %833 = vmatpush1.bf16.msra.mxu0 %v3761_v15  ;;  %v3798_v43 = vld [vmem:[%s4442_s11 + $0x190] ss:$8 sps:$4 sm:$0xff]   ;;  %v3801_v45 = vld [vmem:[%s4442_s11 + $0x1a4] ss:$8 sps:$4 sm:$0xff]   ;;  %v4493_v47 = vshrl.u32 %v653_v41, 7 }
  0x34   : > { %1059 = vmatpush1.bf16.msra.mxu1 %v3762_v16  ;;  %834 = vmatprep.subr.bf16.mxu0 %v3763_v17  ;;  %v652_v46 = vunpack.c.0.s8 %v651_v40  ;;  %v3803_v48 = vld [vmem:[%s4442_s11 + $0xa0] ss:$8 sps:$4 sm:$0xff]   ;;  %v3805_v50 = vld [vmem:[%s4442_s11 + $0xb4] ss:$8 sps:$4 sm:$0xff]   ;;  %v3809_v52 = vld [vmem:[%s4442_s11 + $0xb0] ss:$8 sps:$4 sm:$0xff]  }
  0x35   : > { %1060 = vmatprep.subr.bf16.mxu1 %v3765_v18  ;;  %v3804_v49 = vld [vmem:[%s4442_s11 + $0x1a0] ss:$8 sps:$4 sm:$0xff]   ;;  %v3807_v51 = vld [vmem:[%s4442_s11 + $0x1b4] ss:$8 sps:$4 sm:$0xff]   ;;  %v3810_v55 = vld [vmem:[%s4442_s11 + $0x1b0] ss:$8 sps:$4 sm:$0xff]  }
  0x36   : > { %v4501_v53 = vsub.s32 %v652_v46, %v4493_v47  ;;  %v3335_v54 = vld.sshfl [vmem:[%s4437_s10] sm:$0x11 pattern:$0x75316420]  ;;  %v3811_v58 = vld [vmem:[%s4442_s11 + $0xc4] ss:$8 sps:$4 sm:$0xff]  }
  0x37   : > { %835 = vmatpush1.bf16.msra.mxu0 %v3767_v19  ;;  %v649_v56 = vcombine.high %v3335_v54, %v3335_v54  ;;  %v3368_v57 = vld.sshfl [vmem:[%s4437_s10 + $0x2] sm:$0x11 pattern:$0x75316420]  ;;  %v3813_v59 = vld [vmem:[%s4442_s11 + $0x1c4] ss:$8 sps:$4 sm:$0xff]  }
  0x38   : > { %1061 = vmatpush1.bf16.msra.mxu1 %v3768_v20  ;;  %836 = vmatprep.subr.bf16.mxu0 %v3769_v21  ;;  %v875_v60 = vcombine.high %v3368_v57, %v3368_v57  ;;  %v3815_v62 = vld [vmem:[%s4442_s11 + $0xc0] ss:$8 sps:$4 sm:$0xff]   ;;  %v3817_v1 = vld [vmem:[%s4442_s11 + $0xd4] ss:$8 sps:$4 sm:$0xff]   ;;  %v3821_v3 = vld [vmem:[%s4442_s11 + $0xd0] ss:$8 sps:$4 sm:$0xff]   ;;  %v656_v15 = vrot.slane %v3335_v54, %v4501_v53  ;;  %v882_v16 = vrot.slane %v3368_v57, %v4501_v53 }
  0x39   : > { %1062 = vmatprep.subr.bf16.mxu1 %v3771_v22  ;;  %v663_v61 = vrot.slane %v649_v56, %v4501_v53  ;;  %v3816_v0 = vld [vmem:[%s4442_s11 + $0x1c0] ss:$8 sps:$4 sm:$0xff]   ;;  %v3819_v2 = vld [vmem:[%s4442_s11 + $0x1d4] ss:$8 sps:$4 sm:$0xff]   ;;  %v3822_v4 = vld [vmem:[%s4442_s11 + $0x1d0] ss:$8 sps:$4 sm:$0xff]  }
  0x3a   : > { %v889_v63 = vrot.slane %v875_v60, %v4501_v53  ;;  %v3823_v5 = vld [vmem:[%s4442_s11 + $0xe4] ss:$8 sps:$4 sm:$0xff]   ;;  %v3827_v7 = vld [vmem:[%s4442_s11 + $0xe0] ss:$8 sps:$4 sm:$0xff]   ;;  %v3829_v9 = vld [vmem:[%s4442_s11 + $0xf4] ss:$8 sps:$4 sm:$0xff]  }
  0x3b   : > { %837 = vmatpush1.bf16.msra.mxu0 %v3773_v23  ;;  %858 = vmatprep.mubr.bf16.mxu0 %v663_v61  ;;  %v3825_v6 = vld [vmem:[%s4442_s11 + $0x1e4] ss:$8 sps:$4 sm:$0xff]   ;;  %v3828_v8 = vld [vmem:[%s4442_s11 + $0x1e0] ss:$8 sps:$4 sm:$0xff]   ;;  %v3831_v10 = vld [vmem:[%s4442_s11 + $0x1f4] ss:$8 sps:$4 sm:$0xff]  }
  0x3c   : > { %1063 = vmatpush1.bf16.msra.mxu1 %v3774_v24  ;;  %838 = vmatprep.subr.bf16.mxu0 %v3775_v25  ;;  %v3833_v11 = vld [vmem:[%s4442_s11 + $0xf0] ss:$8 sps:$4 sm:$0xff]   ;;  %v3837_v13 = vld [vmem:[%s4442_s11 + $0x204] ss:$8 sps:$4 sm:$0xff]   ;;  %v3835_v17 = vld [vmem:[%s4442_s11 + $0x200] ss:$8 sps:$4 sm:$0xff]  }
  0x3d   : > { %1064 = vmatprep.subr.bf16.mxu1 %v3777_v26  ;;  %1084 = vmatprep.mubr.bf16.mxu1 %v889_v63  ;;  %v3834_v12 = vld [vmem:[%s4442_s11 + $0x1f0] ss:$8 sps:$4 sm:$0xff]   ;;  %v3840_v14 = vld [vmem:[%s4442_s11 + $0x304] ss:$8 sps:$4 sm:$0xff]   ;;  %v3838_v18 = vld [vmem:[%s4442_s11 + $0x300] ss:$8 sps:$4 sm:$0xff]  }
  0x3e   : > { %v3843_v19 = vld [vmem:[%s4442_s11 + $0x214] ss:$8 sps:$4 sm:$0xff]   ;;  %v3841_v21 = vld [vmem:[%s4442_s11 + $0x210] ss:$8 sps:$4 sm:$0xff]   ;;  %v3849_v23 = vld [vmem:[%s4442_s11 + $0x224] ss:$8 sps:$4 sm:$0xff]  }
  0x3f   : > { %839 = vmatpush1.bf16.msra.mxu0 %v3779_v27  ;;  %v3846_v20 = vld [vmem:[%s4442_s11 + $0x314] ss:$8 sps:$4 sm:$0xff]   ;;  %v3844_v22 = vld [vmem:[%s4442_s11 + $0x310] ss:$8 sps:$4 sm:$0xff]   ;;  %v3852_v24 = vld [vmem:[%s4442_s11 + $0x324] ss:$8 sps:$4 sm:$0xff]  }
  0x40   : > { %1065 = vmatpush1.bf16.msra.mxu1 %v3780_v28  ;;  %840 = vmatprep.subr.bf16.mxu0 %v3781_v29  ;;  %v3847_v25 = vld [vmem:[%s4442_s11 + $0x220] ss:$8 sps:$4 sm:$0xff]   ;;  %v3855_v27 = vld [vmem:[%s4442_s11 + $0x234] ss:$8 sps:$4 sm:$0xff]   ;;  %v3853_v29 = vld [vmem:[%s4442_s11 + $0x230] ss:$8 sps:$4 sm:$0xff]  }
  0x41   : > { %1066 = vmatprep.subr.bf16.mxu1 %v3783_v30  ;;  %v3850_v26 = vld [vmem:[%s4442_s11 + $0x320] ss:$8 sps:$4 sm:$0xff]   ;;  %v3858_v28 = vld [vmem:[%s4442_s11 + $0x334] ss:$8 sps:$4 sm:$0xff]   ;;  %v3856_v30 = vld [vmem:[%s4442_s11 + $0x330] ss:$8 sps:$4 sm:$0xff]  }
  0x42   : > { %v3873_v39 = vld [vmem:[%s4442_s11 + $0x264] ss:$8 sps:$4 sm:$0xff]   ;;  %v3880_v54 = vld [vmem:[%s4442_s11 + $0x370] ss:$8 sps:$4 sm:$0xff]   ;;  %v3883_v57 = vld [vmem:[%s4442_s11 + $0x280] ss:$8 sps:$4 sm:$0xff]  }
  0x43   : > { %841 = vmatpush1.bf16.msra.mxu0 %v3785_v31  ;;  %v3861_v31 = vld [vmem:[%s4442_s11 + $0x244] ss:$8 sps:$4 sm:$0xff]   ;;  %v3894_v60 = vld [vmem:[%s4442_s11 + $0x394] ss:$8 sps:$4 sm:$0xff]   ;;  %v3889_v61 = vld [vmem:[%s4442_s11 + $0x290] ss:$8 sps:$4 sm:$0xff]  }
  0x44   : > { %1067 = vmatpush1.bf16.msra.mxu1 %v3786_v32  ;;  %842 = vmatprep.subr.bf16.mxu0 %v3787_v33  ;;  %v3864_v32 = vld [vmem:[%s4442_s11 + $0x344] ss:$8 sps:$4 sm:$0xff]   ;;  %v3859_v33 = vld [vmem:[%s4442_s11 + $0x240] ss:$8 sps:$4 sm:$0xff]  }
  0x45   : > { %1068 = vmatprep.subr.bf16.mxu1 %v3789_v34  ;;  %v3862_v34 = vld [vmem:[%s4442_s11 + $0x340] ss:$8 sps:$4 sm:$0xff]   ;;  %v3876_v40 = vld [vmem:[%s4442_s11 + $0x364] ss:$8 sps:$4 sm:$0xff]  }
  0x46   : > { %v4553_v41 = vld.sshfl [vmem:[%s4437_s10 + $0x4] sm:$0x11 pattern:$0x75316420] }
  0x47   : > { %843 = vmatpush1.bf16.msra.mxu0 %v3791_v35  ;;  %v3867_v35 = vld [vmem:[%s4442_s11 + $0x254] ss:$8 sps:$4 sm:$0xff]   ;;  %v3888_v56 = vld [vmem:[%s4442_s11 + $0x384] ss:$8 sps:$4 sm:$0xff]  }
  0x48   : > { %1069 = vmatpush1.bf16.msra.mxu1 %v3792_v36  ;;  %844 = vmatprep.subr.bf16.mxu0 %v3793_v37  ;;  %v3870_v36 = vld [vmem:[%s4442_s11 + $0x354] ss:$8 sps:$4 sm:$0xff]   ;;  %v3865_v37 = vld [vmem:[%s4442_s11 + $0x250] ss:$8 sps:$4 sm:$0xff]   ;;  %v3897_v63 = vld [vmem:[%s4442_s11 + $0x2a4] ss:$8 sps:$4 sm:$0xff]  }
  0x49   : > { %1070 = vmatprep.subr.bf16.mxu1 %v3795_v38  ;;  %v3868_v38 = vld [vmem:[%s4442_s11 + $0x350] ss:$8 sps:$4 sm:$0xff]  }
  0x4b   : > { %845 = vmatpush1.bf16.msra.mxu0 %v3797_v42  ;;  %v1101_v42 = vcombine.high %v4553_v41, %v4553_v41 }
  0x4c   : > { %1071 = vmatpush1.bf16.msra.mxu1 %v3798_v43  ;;  %846 = vmatprep.subr.bf16.mxu0 %v3799_v44  ;;  %v4558_v43 = vld.sshfl [vmem:[%s4437_s10 + $0x6] sm:$0x11 pattern:$0x75316420]  ;;  %v3871_v44 = vld [vmem:[%s4442_s11 + $0x260] ss:$8 sps:$4 sm:$0xff]  }
  0x4d   : > { %1072 = vmatprep.subr.bf16.mxu1 %v3801_v45  ;;  %v3874_v45 = vld [vmem:[%s4442_s11 + $0x360] ss:$8 sps:$4 sm:$0xff]   ;;  %v1327_v46 = vcombine.high %v4558_v43, %v4558_v43 }
  0x4f   : > { %847 = vmatpush1.bf16.msra.mxu0 %v3803_v48  ;;  %v3879_v48 = vld [vmem:[%s4442_s11 + $0x274] ss:$8 sps:$4 sm:$0xff]  }
  0x50   : > { %1073 = vmatpush1.bf16.msra.mxu1 %v3804_v49  ;;  %848 = vmatprep.subr.bf16.mxu0 %v3805_v50  ;;  %v3882_v49 = vld [vmem:[%s4442_s11 + $0x374] ss:$8 sps:$4 sm:$0xff]   ;;  %v1115_v50 = vrot.slane %v1101_v42, %v4501_v53  ;;  %v3946_v42 = vld [vmem:[%s4442_s11 + $0x520] ss:$8 sps:$4 sm:$0xff]  }
  0x51   : > { %1074 = vmatprep.subr.bf16.mxu1 %v3807_v51  ;;  %v1341_v51 = vrot.slane %v1327_v46, %v4501_v53  ;;  %v3952_v46 = vld [vmem:[%s4442_s11 + $0x530] ss:$8 sps:$4 sm:$0xff]  }
  0x53   : > { %849 = vmatpush1.bf16.msra.mxu0 %v3809_v52  ;;  %v3877_v52 = vld [vmem:[%s4442_s11 + $0x270] ss:$8 sps:$4 sm:$0xff]  }
  0x54   : > { %1075 = vmatpush1.bf16.msra.mxu1 %v3810_v55  ;;  %850 = vmatprep.subr.bf16.mxu0 %v3811_v58  ;;  %v3885_v55 = vld [vmem:[%s4442_s11 + $0x284] ss:$8 sps:$4 sm:$0xff]   ;;  %v3886_v58 = vld [vmem:[%s4442_s11 + $0x380] ss:$8 sps:$4 sm:$0xff]  }
  0x55   : > { %1076 = vmatprep.subr.bf16.mxu1 %v3813_v59  ;;  %v3891_v59 = vld [vmem:[%s4442_s11 + $0x294] ss:$8 sps:$4 sm:$0xff]  }
  0x57   : > { %851 = vmatpush1.bf16.msra.mxu0 %v3815_v62  ;;  %v3892_v62 = vld [vmem:[%s4442_s11 + $0x390] ss:$8 sps:$4 sm:$0xff]  }
  0x58   : > { %1077 = vmatpush1.bf16.msra.mxu1 %v3816_v0  ;;  %852 = vmatprep.subr.bf16.mxu0 %v3817_v1  ;;  %v3900_v0 = vld [vmem:[%s4442_s11 + $0x3a4] ss:$8 sps:$4 sm:$0xff]   ;;  %v3895_v1 = vld [vmem:[%s4442_s11 + $0x2a0] ss:$8 sps:$4 sm:$0xff]  }
  0x59   : > { %1078 = vmatprep.subr.bf16.mxu1 %v3819_v2  ;;  %v3898_v2 = vld [vmem:[%s4442_s11 + $0x3a0] ss:$8 sps:$4 sm:$0xff]  }
  0x5b   : > { %853 = vmatpush1.bf16.msra.mxu0 %v3821_v3  ;;  %v3903_v3 = vld [vmem:[%s4442_s11 + $0x2b4] ss:$8 sps:$4 sm:$0xff]  }
  0x5c   : > { %1079 = vmatpush1.bf16.msra.mxu1 %v3822_v4  ;;  %854 = vmatprep.subr.bf16.mxu0 %v3823_v5  ;;  %v3906_v4 = vld [vmem:[%s4442_s11 + $0x3b4] ss:$8 sps:$4 sm:$0xff]   ;;  %v3901_v5 = vld [vmem:[%s4442_s11 + $0x2b0] ss:$8 sps:$4 sm:$0xff]  }
  0x5d   : > { %1080 = vmatprep.subr.bf16.mxu1 %v3825_v6  ;;  %v3904_v6 = vld [vmem:[%s4442_s11 + $0x3b0] ss:$8 sps:$4 sm:$0xff]  }
  0x5f   : > { %855 = vmatpush1.bf16.msra.mxu0 %v3827_v7  ;;  %v3909_v7 = vld [vmem:[%s4442_s11 + $0x2c4] ss:$8 sps:$4 sm:$0xff]  }
  0x60   : > { %1081 = vmatpush1.bf16.msra.mxu1 %v3828_v8  ;;  %856 = vmatprep.subr.bf16.mxu0 %v3829_v9  ;;  %v3912_v8 = vld [vmem:[%s4442_s11 + $0x3c4] ss:$8 sps:$4 sm:$0xff]   ;;  %v3907_v9 = vld [vmem:[%s4442_s11 + $0x2c0] ss:$8 sps:$4 sm:$0xff]  }
  0x61   : > { %1082 = vmatprep.subr.bf16.mxu1 %v3831_v10  ;;  %v3910_v10 = vld [vmem:[%s4442_s11 + $0x3c0] ss:$8 sps:$4 sm:$0xff]  }
  0x63   : > { %857 = vmatpush1.bf16.msra.mxu0 %v3833_v11  ;;  %v3915_v11 = vld [vmem:[%s4442_s11 + $0x2d4] ss:$8 sps:$4 sm:$0xff]  }
  0x64   : > { %1083 = vmatpush1.bf16.msra.mxu1 %v3834_v12  ;;  %1278 = vmatprep.subr.bf16.mxu0 %v3837_v13  ;;  %v3918_v12 = vld [vmem:[%s4442_s11 + $0x3d4] ss:$8 sps:$4 sm:$0xff]   ;;  %v3913_v13 = vld [vmem:[%s4442_s11 + $0x2d0] ss:$8 sps:$4 sm:$0xff]  }
  0x65   : > { %1504 = vmatprep.subr.bf16.mxu1 %v3840_v14  ;;  %v3916_v14 = vld [vmem:[%s4442_s11 + $0x3d0] ss:$8 sps:$4 sm:$0xff]  }
  0x66   : > { %859 = vmatmul.mubr.bf16.vlgmr.msra.gmra.mrb[0].mxu0 %v656_v15  ;;  %v3921_v15 = vld [vmem:[%s4442_s11 + $0x2e4] ss:$8 sps:$4 sm:$0xff]  }
  0x67   : > { %1085 = vmatmul.mubr.bf16.vlgmr.msra.gmra.mrb[0].mxu1 %v882_v16  ;;  %1279 = vmatpush1.bf16.msra.mxu0 %v3835_v17  ;;  %v3924_v16 = vld [vmem:[%s4442_s11 + $0x3e4] ss:$8 sps:$4 sm:$0xff]   ;;  %v3919_v17 = vld [vmem:[%s4442_s11 + $0x2e0] ss:$8 sps:$4 sm:$0xff]  }
  0x68   : > { %1505 = vmatpush1.bf16.msra.mxu1 %v3838_v18  ;;  %1280 = vmatprep.subr.bf16.mxu0 %v3843_v19  ;;  %v3922_v18 = vld [vmem:[%s4442_s11 + $0x3e0] ss:$8 sps:$4 sm:$0xff]   ;;  %v3927_v19 = vld [vmem:[%s4442_s11 + $0x2f4] ss:$8 sps:$4 sm:$0xff]  }
  0x69   : > { %1506 = vmatprep.subr.bf16.mxu1 %v3846_v20  ;;  %1310 = vmatprep.mubr.bf16.mxu0 %v1115_v50  ;;  %v3930_v20 = vld [vmem:[%s4442_s11 + $0x3f4] ss:$8 sps:$4 sm:$0xff]   ;;  %v3955_v50 = vld [vmem:[%s4442_s11 + $0x440] ss:$8 sps:$4 sm:$0xff]  }
  0x6a   : > { %1536 = vmatprep.mubr.bf16.mxu1 %v1341_v51  ;;  %v3958_v51 = vld [vmem:[%s4442_s11 + $0x540] ss:$8 sps:$4 sm:$0xff]  }
  0x6b   : > { %1281 = vmatpush1.bf16.msra.mxu0 %v3841_v21  ;;  %v3925_v21 = vld [vmem:[%s4442_s11 + $0x2f0] ss:$8 sps:$4 sm:$0xff]  }
  0x6c   : > { %1507 = vmatpush1.bf16.msra.mxu1 %v3844_v22  ;;  %1282 = vmatprep.subr.bf16.mxu0 %v3849_v23  ;;  %v3928_v22 = vld [vmem:[%s4442_s11 + $0x3f0] ss:$8 sps:$4 sm:$0xff]   ;;  %v3933_v23 = vld [vmem:[%s4442_s11 + $0x404] ss:$8 sps:$4 sm:$0xff]  }
  0x6d   : > { %1508 = vmatprep.subr.bf16.mxu1 %v3852_v24  ;;  %v3936_v24 = vld [vmem:[%s4442_s11 + $0x504] ss:$8 sps:$4 sm:$0xff]  }
  0x6f   : > { %1283 = vmatpush1.bf16.msra.mxu0 %v3847_v25  ;;  %v1108_v25 = vrot.slane %v4553_v41, %v4501_v53  ;;  %v3943_v41 = vld [vmem:[%s4442_s11 + $0x420] ss:$8 sps:$4 sm:$0xff]  }
  0x70   : > { %1509 = vmatpush1.bf16.msra.mxu1 %v3850_v26  ;;  %1284 = vmatprep.subr.bf16.mxu0 %v3855_v27  ;;  %v1334_v26 = vrot.slane %v4558_v43, %v4501_v53  ;;  %v3931_v27 = vld [vmem:[%s4442_s11 + $0x400] ss:$8 sps:$4 sm:$0xff]   ;;  %v3951_v43 = vld [vmem:[%s4442_s11 + $0x434] ss:$8 sps:$4 sm:$0xff]  }
  0x71   : > { %1510 = vmatprep.subr.bf16.mxu1 %v3858_v28  ;;  %v3934_v28 = vld [vmem:[%s4442_s11 + $0x500] ss:$8 sps:$4 sm:$0xff]  }
  0x73   : > { %1285 = vmatpush1.bf16.msra.mxu0 %v3853_v29  ;;  %v3939_v29 = vld [vmem:[%s4442_s11 + $0x414] ss:$8 sps:$4 sm:$0xff]  }
  0x74   : > { %1511 = vmatpush1.bf16.msra.mxu1 %v3856_v30  ;;  %1286 = vmatprep.subr.bf16.mxu0 %v3861_v31  ;;  %v3942_v30 = vld [vmem:[%s4442_s11 + $0x514] ss:$8 sps:$4 sm:$0xff]   ;;  %v4613_v31 = vld.sshfl [vmem:[%s4437_s10 + $0x8] sm:$0x11 pattern:$0x75316420] }
  0x75   : > { %1512 = vmatprep.subr.bf16.mxu1 %v3864_v32  ;;  %v3937_v32 = vld [vmem:[%s4442_s11 + $0x410] ss:$8 sps:$4 sm:$0xff]  }
  0x77   : > { %1287 = vmatpush1.bf16.msra.mxu0 %v3859_v33  ;;  %v1553_v33 = vcombine.high %v4613_v31, %v4613_v31 }
  0x78   : > { %1513 = vmatpush1.bf16.msra.mxu1 %v3862_v34  ;;  %1288 = vmatprep.subr.bf16.mxu0 %v3867_v35  ;;  %v4619_v34 = vld.sshfl [vmem:[%s4437_s10 + $0xa] sm:$0x11 pattern:$0x75316420]  ;;  %v3940_v35 = vld [vmem:[%s4442_s11 + $0x510] ss:$8 sps:$4 sm:$0xff]  }
  0x79   : > { %1514 = vmatprep.subr.bf16.mxu1 %v3870_v36  ;;  %v1779_v36 = vcombine.high %v4619_v34, %v4619_v34 }
  0x7b   : > { %1289 = vmatpush1.bf16.msra.mxu0 %v3865_v37  ;;  %v3945_v37 = vld [vmem:[%s4442_s11 + $0x424] ss:$8 sps:$4 sm:$0xff]  }
  0x7c   : > { %1515 = vmatpush1.bf16.msra.mxu1 %v3868_v38  ;;  %1290 = vmatprep.subr.bf16.mxu0 %v3873_v39  ;;  %v3948_v38 = vld [vmem:[%s4442_s11 + $0x524] ss:$8 sps:$4 sm:$0xff]   ;;  %v1567_v39 = vrot.slane %v1553_v33, %v4501_v53 }
  0x7d   : > { %1516 = vmatprep.subr.bf16.mxu1 %v3876_v40  ;;  %v1793_v40 = vrot.slane %v1779_v36, %v4501_v53  ;;  %v4684_v33 = vld.sshfl [vmem:[%s4437_s10 + $0xe] sm:$0x11 pattern:$0x75316420]  ;;  %v4024_v36 = vld [vmem:[%s4442_s11 + $0x5f0] ss:$8 sps:$4 sm:$0xff]  }
  0x7f   : > { %1291 = vmatpush1.bf16.msra.mxu0 %v3871_v44  ;;  %v3954_v44 = vld [vmem:[%s4442_s11 + $0x534] ss:$8 sps:$4 sm:$0xff]  }
  0x80   : > { %1517 = vmatpush1.bf16.msra.mxu1 %v3874_v45  ;;  %1292 = vmatprep.subr.bf16.mxu0 %v3879_v48  ;;  %v3949_v45 = vld [vmem:[%s4442_s11 + $0x430] ss:$8 sps:$4 sm:$0xff]   ;;  %v3957_v48 = vld [vmem:[%s4442_s11 + $0x444] ss:$8 sps:$4 sm:$0xff]  }
  0x81   : > { %1518 = vmatprep.subr.bf16.mxu1 %v3882_v49  ;;  %v3960_v49 = vld [vmem:[%s4442_s11 + $0x544] ss:$8 sps:$4 sm:$0xff]  }
  0x83   : > { %1293 = vmatpush1.bf16.msra.mxu0 %v3877_v52  ;;  %v3963_v52 = vld [vmem:[%s4442_s11 + $0x454] ss:$8 sps:$4 sm:$0xff]  }
  0x84   : > { %1519 = vmatpush1.bf16.msra.mxu1 %v3880_v54  ;;  %1294 = vmatprep.subr.bf16.mxu0 %v3885_v55  ;;  %v3966_v54 = vld [vmem:[%s4442_s11 + $0x554] ss:$8 sps:$4 sm:$0xff]   ;;  %v3961_v55 = vld [vmem:[%s4442_s11 + $0x450] ss:$8 sps:$4 sm:$0xff]  }
  0x85   : > { %1520 = vmatprep.subr.bf16.mxu1 %v3888_v56  ;;  %v3964_v56 = vld [vmem:[%s4442_s11 + $0x550] ss:$8 sps:$4 sm:$0xff]  }
  0x87   : > { %1295 = vmatpush1.bf16.msra.mxu0 %v3883_v57  ;;  %v3969_v57 = vld [vmem:[%s4442_s11 + $0x464] ss:$8 sps:$4 sm:$0xff]  }
  0x88   : > { %1521 = vmatpush1.bf16.msra.mxu1 %v3886_v58  ;;  %1296 = vmatprep.subr.bf16.mxu0 %v3891_v59  ;;  %v3972_v58 = vld [vmem:[%s4442_s11 + $0x564] ss:$8 sps:$4 sm:$0xff]   ;;  %v3967_v59 = vld [vmem:[%s4442_s11 + $0x460] ss:$8 sps:$4 sm:$0xff]  }
  0x89   : > { %1522 = vmatprep.subr.bf16.mxu1 %v3894_v60  ;;  %v3970_v60 = vld [vmem:[%s4442_s11 + $0x560] ss:$8 sps:$4 sm:$0xff]  }
  0x8b   : > { %1297 = vmatpush1.bf16.msra.mxu0 %v3889_v61  ;;  %v3975_v61 = vld [vmem:[%s4442_s11 + $0x474] ss:$8 sps:$4 sm:$0xff]  }
  0x8c   : > { %1523 = vmatpush1.bf16.msra.mxu1 %v3892_v62  ;;  %1298 = vmatprep.subr.bf16.mxu0 %v3897_v63  ;;  %v3978_v62 = vld [vmem:[%s4442_s11 + $0x574] ss:$8 sps:$4 sm:$0xff]   ;;  %v3973_v63 = vld [vmem:[%s4442_s11 + $0x470] ss:$8 sps:$4 sm:$0xff]  }
  0x8d   : > { %1524 = vmatprep.subr.bf16.mxu1 %v3900_v0  ;;  %v3976_v0 = vld [vmem:[%s4442_s11 + $0x570] ss:$8 sps:$4 sm:$0xff]  }
  0x8f   : > { %1299 = vmatpush1.bf16.msra.mxu0 %v3895_v1  ;;  %v3981_v1 = vld [vmem:[%s4442_s11 + $0x484] ss:$8 sps:$4 sm:$0xff]  }
  0x90   : > { %1525 = vmatpush1.bf16.msra.mxu1 %v3898_v2  ;;  %1300 = vmatprep.subr.bf16.mxu0 %v3903_v3  ;;  %v3984_v2 = vld [vmem:[%s4442_s11 + $0x584] ss:$8 sps:$4 sm:$0xff]   ;;  %v3979_v3 = vld [vmem:[%s4442_s11 + $0x480] ss:$8 sps:$4 sm:$0xff]  }
  0x91   : > { %1526 = vmatprep.subr.bf16.mxu1 %v3906_v4  ;;  %v3982_v4 = vld [vmem:[%s4442_s11 + $0x580] ss:$8 sps:$4 sm:$0xff]  }
  0x93   : > { %1301 = vmatpush1.bf16.msra.mxu0 %v3901_v5  ;;  %v3987_v5 = vld [vmem:[%s4442_s11 + $0x494] ss:$8 sps:$4 sm:$0xff]  }
  0x94   : > { %1527 = vmatpush1.bf16.msra.mxu1 %v3904_v6  ;;  %1302 = vmatprep.subr.bf16.mxu0 %v3909_v7  ;;  %v3990_v6 = vld [vmem:[%s4442_s11 + $0x594] ss:$8 sps:$4 sm:$0xff]   ;;  %v3985_v7 = vld [vmem:[%s4442_s11 + $0x490] ss:$8 sps:$4 sm:$0xff]  }
  0x95   : > { %1528 = vmatprep.subr.bf16.mxu1 %v3912_v8  ;;  %v3988_v8 = vld [vmem:[%s4442_s11 + $0x590] ss:$8 sps:$4 sm:$0xff]  }
  0x97   : > { %1303 = vmatpush1.bf16.msra.mxu0 %v3907_v9  ;;  %v3993_v9 = vld [vmem:[%s4442_s11 + $0x4a4] ss:$8 sps:$4 sm:$0xff]  }
  0x98   : > { %1529 = vmatpush1.bf16.msra.mxu1 %v3910_v10  ;;  %1304 = vmatprep.subr.bf16.mxu0 %v3915_v11  ;;  %v3996_v10 = vld [vmem:[%s4442_s11 + $0x5a4] ss:$8 sps:$4 sm:$0xff]   ;;  %v3991_v11 = vld [vmem:[%s4442_s11 + $0x4a0] ss:$8 sps:$4 sm:$0xff]  }
  0x99   : > { %1530 = vmatprep.subr.bf16.mxu1 %v3918_v12  ;;  %v3994_v12 = vld [vmem:[%s4442_s11 + $0x5a0] ss:$8 sps:$4 sm:$0xff]  }
  0x9b   : > { %1305 = vmatpush1.bf16.msra.mxu0 %v3913_v13  ;;  %v3999_v13 = vld [vmem:[%s4442_s11 + $0x4b4] ss:$8 sps:$4 sm:$0xff]  }
  0x9c   : > { %1531 = vmatpush1.bf16.msra.mxu1 %v3916_v14  ;;  %1306 = vmatprep.subr.bf16.mxu0 %v3921_v15  ;;  %v4002_v14 = vld [vmem:[%s4442_s11 + $0x5b4] ss:$8 sps:$4 sm:$0xff]   ;;  %v3997_v15 = vld [vmem:[%s4442_s11 + $0x4b0] ss:$8 sps:$4 sm:$0xff]  }
  0x9d   : > { %1532 = vmatprep.subr.bf16.mxu1 %v3924_v16  ;;  %v4000_v16 = vld [vmem:[%s4442_s11 + $0x5b0] ss:$8 sps:$4 sm:$0xff]  }
  0x9f   : > { %1307 = vmatpush1.bf16.msra.mxu0 %v3919_v17  ;;  %v4005_v17 = vld [vmem:[%s4442_s11 + $0x4c4] ss:$8 sps:$4 sm:$0xff]  }
  0xa0   : > { %1533 = vmatpush1.bf16.msra.mxu1 %v3922_v18  ;;  %1308 = vmatprep.subr.bf16.mxu0 %v3927_v19  ;;  %v4008_v18 = vld [vmem:[%s4442_s11 + $0x5c4] ss:$8 sps:$4 sm:$0xff]   ;;  %v4003_v19 = vld [vmem:[%s4442_s11 + $0x4c0] ss:$8 sps:$4 sm:$0xff]  }
  0xa1   : > { %1534 = vmatprep.subr.bf16.mxu1 %v3930_v20  ;;  %v4006_v20 = vld [vmem:[%s4442_s11 + $0x5c0] ss:$8 sps:$4 sm:$0xff]  }
  0xa3   : > { %1309 = vmatpush1.bf16.msra.mxu0 %v3925_v21  ;;  %v4011_v21 = vld [vmem:[%s4442_s11 + $0x4d4] ss:$8 sps:$4 sm:$0xff]  }
  0xa4   : > { %1535 = vmatpush1.bf16.msra.mxu1 %v3928_v22  ;;  %1730 = vmatprep.subr.bf16.mxu0 %v3933_v23  ;;  %v4014_v22 = vld [vmem:[%s4442_s11 + $0x5d4] ss:$8 sps:$4 sm:$0xff]   ;;  %v4009_v23 = vld [vmem:[%s4442_s11 + $0x4d0] ss:$8 sps:$4 sm:$0xff]  }
  0xa5   : > { %1956 = vmatprep.subr.bf16.mxu1 %v3936_v24  ;;  %v4012_v24 = vld [vmem:[%s4442_s11 + $0x5d0] ss:$8 sps:$4 sm:$0xff]  }
  0xa6   : > { %1311 = vmatmul.mubr.bf16.vlgmr.msra.gmra.mrb[4].mxu0 %v1108_v25  ;;  %v4017_v25 = vld [vmem:[%s4442_s11 + $0x4e4] ss:$8 sps:$4 sm:$0xff]  }
  0xa7   : > { %1537 = vmatmul.mubr.bf16.vlgmr.msra.gmra.mrb[4].mxu1 %v1334_v26  ;;  %1731 = vmatpush1.bf16.msra.mxu0 %v3931_v27  ;;  %v4020_v26 = vld [vmem:[%s4442_s11 + $0x5e4] ss:$8 sps:$4 sm:$0xff]   ;;  %v4015_v27 = vld [vmem:[%s4442_s11 + $0x4e0] ss:$8 sps:$4 sm:$0xff]  }
  0xa8   : > { %1957 = vmatpush1.bf16.msra.mxu1 %v3934_v28  ;;  %1732 = vmatprep.subr.bf16.mxu0 %v3939_v29  ;;  %v4018_v28 = vld [vmem:[%s4442_s11 + $0x5e0] ss:$8 sps:$4 sm:$0xff]   ;;  %v4023_v29 = vld [vmem:[%s4442_s11 + $0x4f4] ss:$8 sps:$4 sm:$0xff]  }
  0xa9   : > { %1958 = vmatprep.subr.bf16.mxu1 %v3942_v30  ;;  %1762 = vmatprep.mubr.bf16.mxu0 %v1567_v39  ;;  %v4026_v30 = vld [vmem:[%s4442_s11 + $0x5f4] ss:$8 sps:$4 sm:$0xff]  }
  0xaa   : > { %1988 = vmatprep.mubr.bf16.mxu1 %v1793_v40  ;;  %v2231_v40 = vcombine.high %v4684_v33, %v4684_v33 }
  0xab   : > { %1733 = vmatpush1.bf16.msra.mxu0 %v3937_v32  ;;  %v4681_v32 = vld.sshfl [vmem:[%s4437_s10 + $0xc] sm:$0x11 pattern:$0x75316420] }
  0xac   : > { %1959 = vmatpush1.bf16.msra.mxu1 %v3940_v35  ;;  %1734 = vmatprep.subr.bf16.mxu0 %v3945_v37  ;;  %v4021_v35 = vld [vmem:[%s4442_s11 + $0x4f0] ss:$8 sps:$4 sm:$0xff]   ;;  %v4029_v37 = vld [vmem:[%s4442_s11 + $0x604] ss:$8 sps:$4 sm:$0xff]   ;;  %v2005_v39 = vcombine.high %v4681_v32, %v4681_v32 }
  0xad   : > { %1960 = vmatprep.subr.bf16.mxu1 %v3948_v38  ;;  %v4032_v38 = vld [vmem:[%s4442_s11 + $0x704] ss:$8 sps:$4 sm:$0xff]  }
  0xaf   : > { %1735 = vmatpush1.bf16.msra.mxu0 %v3943_v41  ;;  %v1560_v41 = vrot.slane %v4613_v31, %v4501_v53  ;;  %v2245_v31 = vrot.slane %v2231_v40, %v4501_v53  ;;  %v4116_v40 = vld [vmem:[%s4442_s11 + $0x7e4] ss:$8 sps:$4 sm:$0xff]  }
  0xb0   : > { %1961 = vmatpush1.bf16.msra.mxu1 %v3946_v42  ;;  %1736 = vmatprep.subr.bf16.mxu0 %v3951_v43  ;;  %v1786_v42 = vrot.slane %v4619_v34, %v4501_v53  ;;  %v4027_v43 = vld [vmem:[%s4442_s11 + $0x600] ss:$8 sps:$4 sm:$0xff]   ;;  %v4033_v34 = vld [vmem:[%s4442_s11 + $0x610] ss:$8 sps:$4 sm:$0xff]  }
  0xb1   : > { %1962 = vmatprep.subr.bf16.mxu1 %v3954_v44  ;;  %v4030_v44 = vld [vmem:[%s4442_s11 + $0x700] ss:$8 sps:$4 sm:$0xff]  }
  0xb3   : > { %1737 = vmatpush1.bf16.msra.mxu0 %v3949_v45  ;;  %v4035_v45 = vld [vmem:[%s4442_s11 + $0x614] ss:$8 sps:$4 sm:$0xff]  }
  0xb4   : > { %1963 = vmatpush1.bf16.msra.mxu1 %v3952_v46  ;;  %1738 = vmatprep.subr.bf16.mxu0 %v3957_v48  ;;  %v4038_v46 = vld [vmem:[%s4442_s11 + $0x714] ss:$8 sps:$4 sm:$0xff]   ;;  %v2019_v48 = vrot.slane %v2005_v39, %v4501_v53  ;;  %v4113_v39 = vld [vmem:[%s4442_s11 + $0x6e4] ss:$8 sps:$4 sm:$0xff]  }
  0xb5   : > { %1964 = vmatprep.subr.bf16.mxu1 %v3960_v49  ;;  %v4036_v49 = vld [vmem:[%s4442_s11 + $0x710] ss:$8 sps:$4 sm:$0xff]  }
  0xb7   : > { %1739 = vmatpush1.bf16.msra.mxu0 %v3955_v50  ;;  %v4041_v50 = vld [vmem:[%s4442_s11 + $0x624] ss:$8 sps:$4 sm:$0xff]  }
  0xb8   : > { %1965 = vmatpush1.bf16.msra.mxu1 %v3958_v51  ;;  %1740 = vmatprep.subr.bf16.mxu0 %v3963_v52  ;;  %v4044_v51 = vld [vmem:[%s4442_s11 + $0x724] ss:$8 sps:$4 sm:$0xff]   ;;  %v4039_v52 = vld [vmem:[%s4442_s11 + $0x620] ss:$8 sps:$4 sm:$0xff]  }
  0xb9   : > { %1966 = vmatprep.subr.bf16.mxu1 %v3966_v54  ;;  %v4042_v54 = vld [vmem:[%s4442_s11 + $0x720] ss:$8 sps:$4 sm:$0xff]  }
  0xbb   : > { %1741 = vmatpush1.bf16.msra.mxu0 %v3961_v55  ;;  %v4047_v55 = vld [vmem:[%s4442_s11 + $0x634] ss:$8 sps:$4 sm:$0xff]  }
  0xbc   : > { %1967 = vmatpush1.bf16.msra.mxu1 %v3964_v56  ;;  %1742 = vmatprep.subr.bf16.mxu0 %v3969_v57  ;;  %v4050_v56 = vld [vmem:[%s4442_s11 + $0x734] ss:$8 sps:$4 sm:$0xff]   ;;  %v4045_v57 = vld [vmem:[%s4442_s11 + $0x630] ss:$8 sps:$4 sm:$0xff]  }
  0xbd   : > { %1968 = vmatprep.subr.bf16.mxu1 %v3972_v58  ;;  %v4048_v58 = vld [vmem:[%s4442_s11 + $0x730] ss:$8 sps:$4 sm:$0xff]  }
  0xbf   : > { %1743 = vmatpush1.bf16.msra.mxu0 %v3967_v59  ;;  %v4053_v59 = vld [vmem:[%s4442_s11 + $0x644] ss:$8 sps:$4 sm:$0xff]  }
  0xc0   : > { %1969 = vmatpush1.bf16.msra.mxu1 %v3970_v60  ;;  %1744 = vmatprep.subr.bf16.mxu0 %v3975_v61  ;;  %v4056_v60 = vld [vmem:[%s4442_s11 + $0x744] ss:$8 sps:$4 sm:$0xff]   ;;  %v4051_v61 = vld [vmem:[%s4442_s11 + $0x640] ss:$8 sps:$4 sm:$0xff]  }
  0xc1   : > { %1970 = vmatprep.subr.bf16.mxu1 %v3978_v62  ;;  %v4054_v62 = vld [vmem:[%s4442_s11 + $0x740] ss:$8 sps:$4 sm:$0xff]  }
  0xc3   : > { %1745 = vmatpush1.bf16.msra.mxu0 %v3973_v63  ;;  %v4059_v63 = vld [vmem:[%s4442_s11 + $0x654] ss:$8 sps:$4 sm:$0xff]  }
  0xc4   : > { %1971 = vmatpush1.bf16.msra.mxu1 %v3976_v0  ;;  %1746 = vmatprep.subr.bf16.mxu0 %v3981_v1  ;;  %v4062_v0 = vld [vmem:[%s4442_s11 + $0x754] ss:$8 sps:$4 sm:$0xff]   ;;  %v4057_v1 = vld [vmem:[%s4442_s11 + $0x650] ss:$8 sps:$4 sm:$0xff]  }
  0xc5   : > { %1972 = vmatprep.subr.bf16.mxu1 %v3984_v2  ;;  %v4060_v2 = vld [vmem:[%s4442_s11 + $0x750] ss:$8 sps:$4 sm:$0xff]  }
  0xc7   : > { %1747 = vmatpush1.bf16.msra.mxu0 %v3979_v3  ;;  %v4065_v3 = vld [vmem:[%s4442_s11 + $0x664] ss:$8 sps:$4 sm:$0xff]  }
  0xc8   : > { %1973 = vmatpush1.bf16.msra.mxu1 %v3982_v4  ;;  %1748 = vmatprep.subr.bf16.mxu0 %v3987_v5  ;;  %v4068_v4 = vld [vmem:[%s4442_s11 + $0x764] ss:$8 sps:$4 sm:$0xff]   ;;  %v4063_v5 = vld [vmem:[%s4442_s11 + $0x660] ss:$8 sps:$4 sm:$0xff]  }
  0xc9   : > { %1974 = vmatprep.subr.bf16.mxu1 %v3990_v6  ;;  %v4066_v6 = vld [vmem:[%s4442_s11 + $0x760] ss:$8 sps:$4 sm:$0xff]  }
  0xcb   : > { %1749 = vmatpush1.bf16.msra.mxu0 %v3985_v7  ;;  %v4071_v7 = vld [vmem:[%s4442_s11 + $0x674] ss:$8 sps:$4 sm:$0xff]  }
  0xcc   : > { %1975 = vmatpush1.bf16.msra.mxu1 %v3988_v8  ;;  %1750 = vmatprep.subr.bf16.mxu0 %v3993_v9  ;;  %v4074_v8 = vld [vmem:[%s4442_s11 + $0x774] ss:$8 sps:$4 sm:$0xff]   ;;  %v4069_v9 = vld [vmem:[%s4442_s11 + $0x670] ss:$8 sps:$4 sm:$0xff]  }
  0xcd   : > { %1976 = vmatprep.subr.bf16.mxu1 %v3996_v10  ;;  %v4072_v10 = vld [vmem:[%s4442_s11 + $0x770] ss:$8 sps:$4 sm:$0xff]  }
  0xcf   : > { %1751 = vmatpush1.bf16.msra.mxu0 %v3991_v11  ;;  %v4077_v11 = vld [vmem:[%s4442_s11 + $0x684] ss:$8 sps:$4 sm:$0xff]  }
  0xd0   : > { %1977 = vmatpush1.bf16.msra.mxu1 %v3994_v12  ;;  %1752 = vmatprep.subr.bf16.mxu0 %v3999_v13  ;;  %v4080_v12 = vld [vmem:[%s4442_s11 + $0x784] ss:$8 sps:$4 sm:$0xff]   ;;  %v4075_v13 = vld [vmem:[%s4442_s11 + $0x680] ss:$8 sps:$4 sm:$0xff]  }
  0xd1   : > { %1978 = vmatprep.subr.bf16.mxu1 %v4002_v14  ;;  %v4078_v14 = vld [vmem:[%s4442_s11 + $0x780] ss:$8 sps:$4 sm:$0xff]  }
  0xd3   : > { %1753 = vmatpush1.bf16.msra.mxu0 %v3997_v15  ;;  %v4083_v15 = vld [vmem:[%s4442_s11 + $0x694] ss:$8 sps:$4 sm:$0xff]  }
  0xd4   : > { %1979 = vmatpush1.bf16.msra.mxu1 %v4000_v16  ;;  %1754 = vmatprep.subr.bf16.mxu0 %v4005_v17  ;;  %v4086_v16 = vld [vmem:[%s4442_s11 + $0x794] ss:$8 sps:$4 sm:$0xff]   ;;  %v4081_v17 = vld [vmem:[%s4442_s11 + $0x690] ss:$8 sps:$4 sm:$0xff]  }
  0xd5   : > { %1980 = vmatprep.subr.bf16.mxu1 %v4008_v18  ;;  %v4084_v18 = vld [vmem:[%s4442_s11 + $0x790] ss:$8 sps:$4 sm:$0xff]  }
  0xd7   : > { %1755 = vmatpush1.bf16.msra.mxu0 %v4003_v19  ;;  %v4089_v19 = vld [vmem:[%s4442_s11 + $0x6a4] ss:$8 sps:$4 sm:$0xff]  }
  0xd8   : > { %1981 = vmatpush1.bf16.msra.mxu1 %v4006_v20  ;;  %1756 = vmatprep.subr.bf16.mxu0 %v4011_v21  ;;  %v4092_v20 = vld [vmem:[%s4442_s11 + $0x7a4] ss:$8 sps:$4 sm:$0xff]   ;;  %v4087_v21 = vld [vmem:[%s4442_s11 + $0x6a0] ss:$8 sps:$4 sm:$0xff]  }
  0xd9   : > { %1982 = vmatprep.subr.bf16.mxu1 %v4014_v22  ;;  %v4090_v22 = vld [vmem:[%s4442_s11 + $0x7a0] ss:$8 sps:$4 sm:$0xff]  }
  0xdb   : > { %1757 = vmatpush1.bf16.msra.mxu0 %v4009_v23  ;;  %v4095_v23 = vld [vmem:[%s4442_s11 + $0x6b4] ss:$8 sps:$4 sm:$0xff]  }
  0xdc   : > { %1983 = vmatpush1.bf16.msra.mxu1 %v4012_v24  ;;  %1758 = vmatprep.subr.bf16.mxu0 %v4017_v25  ;;  %v4098_v24 = vld [vmem:[%s4442_s11 + $0x7b4] ss:$8 sps:$4 sm:$0xff]   ;;  %v4093_v25 = vld [vmem:[%s4442_s11 + $0x6b0] ss:$8 sps:$4 sm:$0xff]  }
  0xdd   : > { %1984 = vmatprep.subr.bf16.mxu1 %v4020_v26  ;;  %v4096_v26 = vld [vmem:[%s4442_s11 + $0x7b0] ss:$8 sps:$4 sm:$0xff]  }
  0xdf   : > { %1759 = vmatpush1.bf16.msra.mxu0 %v4015_v27  ;;  %v4101_v27 = vld [vmem:[%s4442_s11 + $0x6c4] ss:$8 sps:$4 sm:$0xff]  }
  0xe0   : > { %1985 = vmatpush1.bf16.msra.mxu1 %v4018_v28  ;;  %1760 = vmatprep.subr.bf16.mxu0 %v4023_v29  ;;  %v4104_v28 = vld [vmem:[%s4442_s11 + $0x7c4] ss:$8 sps:$4 sm:$0xff]   ;;  %v4099_v29 = vld [vmem:[%s4442_s11 + $0x6c0] ss:$8 sps:$4 sm:$0xff]  }
  0xe1   : > { %1986 = vmatprep.subr.bf16.mxu1 %v4026_v30  ;;  %v4102_v30 = vld [vmem:[%s4442_s11 + $0x7c0] ss:$8 sps:$4 sm:$0xff]  }
  0xe3   : > { %1761 = vmatpush1.bf16.msra.mxu0 %v4021_v35  ;;  %v4107_v35 = vld [vmem:[%s4442_s11 + $0x6d4] ss:$8 sps:$4 sm:$0xff]  }
  0xe4   : > { %1987 = vmatpush1.bf16.msra.mxu1 %v4024_v36  ;;  %2182 = vmatprep.subr.bf16.mxu0 %v4029_v37  ;;  %v4110_v36 = vld [vmem:[%s4442_s11 + $0x7d4] ss:$8 sps:$4 sm:$0xff]   ;;  %v4105_v37 = vld [vmem:[%s4442_s11 + $0x6d0] ss:$8 sps:$4 sm:$0xff]  }
  0xe5   : > { %2408 = vmatprep.subr.bf16.mxu1 %v4032_v38  ;;  %v4108_v38 = vld [vmem:[%s4442_s11 + $0x7d0] ss:$8 sps:$4 sm:$0xff]  }
  0xe6   : > { %1763 = vmatmul.mubr.bf16.vlgmr.msra.gmra.mrb[8].mxu0 %v1560_v41  ;;  %v4111_v41 = vld [vmem:[%s4442_s11 + $0x6e0] ss:$8 sps:$4 sm:$0xff]  }
  0xe7   : > { %1989 = vmatmul.mubr.bf16.vlgmr.msra.gmra.mrb[8].mxu1 %v1786_v42  ;;  %2183 = vmatpush1.bf16.msra.mxu0 %v4027_v43  ;;  %v4114_v42 = vld [vmem:[%s4442_s11 + $0x7e0] ss:$8 sps:$4 sm:$0xff]   ;;  %v4119_v43 = vld [vmem:[%s4442_s11 + $0x6f4] ss:$8 sps:$4 sm:$0xff]  }
  0xe8   : > { %2409 = vmatpush1.bf16.msra.mxu1 %v4030_v44  ;;  %2184 = vmatprep.subr.bf16.mxu0 %v4035_v45  ;;  %v4122_v44 = vld [vmem:[%s4442_s11 + $0x7f4] ss:$8 sps:$4 sm:$0xff]   ;;  %v4117_v45 = vld [vmem:[%s4442_s11 + $0x6f0] ss:$8 sps:$4 sm:$0xff]  }
  0xe9   : > { %2410 = vmatprep.subr.bf16.mxu1 %v4038_v46  ;;  %2214 = vmatprep.mubr.bf16.mxu0 %v2019_v48  ;;  %v4120_v46 = vld [vmem:[%s4442_s11 + $0x7f0] ss:$8 sps:$4 sm:$0xff]   ;;  %v2012_v48 = vrot.slane %v4681_v32, %v4501_v53 }
  0xea   : > { %2440 = vmatprep.mubr.bf16.mxu1 %v2245_v31  ;;  %v2238_v31 = vrot.slane %v4684_v33, %v4501_v53  ;;  %v634_v53 = vld [vmem:[#allocation2 + $0x4] sm:$0xf] }
  0xeb   : > { %2185 = vmatpush1.bf16.msra.mxu0 %v4033_v34  ;;  %v4305_v34 = vmov 1983009808  }
  0xec   : > { %2411 = vmatpush1.bf16.msra.mxu1 %v4036_v49  ;;  %2186 = vmatprep.subr.bf16.mxu0 %v4041_v50  ;;  %v2467_v49 = vunpack.c.l.s4 %v4305_v34 }
  0xed   : > { %2412 = vmatprep.subr.bf16.mxu1 %v4044_v51 }
  0xee   : > { %v2468_v50 = vunpack.c.0.s8 %v2467_v49 }
  0xef   : > { %2187 = vmatpush1.bf16.msra.mxu0 %v4039_v52 }
  0xf0   : > { %2413 = vmatpush1.bf16.msra.mxu1 %v4042_v54  ;;  %2188 = vmatprep.subr.bf16.mxu0 %v4047_v55  ;;  %v4767_v54 = vsub.s32 %v2468_v50, %v4493_v47 }
  0xf1   : > { %2414 = vmatprep.subr.bf16.mxu1 %v4050_v56 }
  0xf3   : > { %2189 = vmatpush1.bf16.msra.mxu0 %v4045_v57 }
  0xf4   : > { %2415 = vmatpush1.bf16.msra.mxu1 %v4048_v58  ;;  %2190 = vmatprep.subr.bf16.mxu0 %v4053_v59 }
  0xf5   : > { %2416 = vmatprep.subr.bf16.mxu1 %v4056_v60  ;;  %v633_v60 = vld [vmem:[#allocation2] sm:$0xf] }
  0xf7   : > { %2191 = vmatpush1.bf16.msra.mxu0 %v4051_v61 }
  0xf8   : > { %2417 = vmatpush1.bf16.msra.mxu1 %v4054_v62  ;;  %2192 = vmatprep.subr.bf16.mxu0 %v4059_v63 }
  0xf9   : > { %2418 = vmatprep.subr.bf16.mxu1 %v4062_v0 }
  0xfb   : > { %2193 = vmatpush1.bf16.msra.mxu0 %v4057_v1 }
  0xfc   : > { %2419 = vmatpush1.bf16.msra.mxu1 %v4060_v2  ;;  %2194 = vmatprep.subr.bf16.mxu0 %v4065_v3 }
  0xfd   : > { %2420 = vmatprep.subr.bf16.mxu1 %v4068_v4 }
  0xff   : > { %2195 = vmatpush1.bf16.msra.mxu0 %v4063_v5 }
 0x100   : > { %2421 = vmatpush1.bf16.msra.mxu1 %v4066_v6  ;;  %2196 = vmatprep.subr.bf16.mxu0 %v4071_v7 }
 0x101   : > { %2422 = vmatprep.subr.bf16.mxu1 %v4074_v8 }
 0x103   : > { %2197 = vmatpush1.bf16.msra.mxu0 %v4069_v9  ;;  %v635_v9 = vld [vmem:[#allocation2 + $0x8] sm:$0xf] }
 0x104   : > { %2423 = vmatpush1.bf16.msra.mxu1 %v4072_v10  ;;  %2198 = vmatprep.subr.bf16.mxu0 %v4077_v11  ;;  %v636_v10 = vld [vmem:[#allocation2 + $0xc] sm:$0xf] }
 0x105   : > { %2424 = vmatprep.subr.bf16.mxu1 %v4080_v12 }
 0x107   : > { %2199 = vmatpush1.bf16.msra.mxu0 %v4075_v13 }
 0x108   : > { %2425 = vmatpush1.bf16.msra.mxu1 %v4078_v14  ;;  %2200 = vmatprep.subr.bf16.mxu0 %v4083_v15 }
 0x109   : > { %2426 = vmatprep.subr.bf16.mxu1 %v4086_v16 }
 0x10b   : > { %2201 = vmatpush1.bf16.msra.mxu0 %v4081_v17 }
 0x10c   : > { %2427 = vmatpush1.bf16.msra.mxu1 %v4084_v18  ;;  %2202 = vmatprep.subr.bf16.mxu0 %v4089_v19 }
 0x10d   : > { %2428 = vmatprep.subr.bf16.mxu1 %v4092_v20 }
 0x10f   : > { %2203 = vmatpush1.bf16.msra.mxu0 %v4087_v21 }
 0x110   : > { %2429 = vmatpush1.bf16.msra.mxu1 %v4090_v22  ;;  %2204 = vmatprep.subr.bf16.mxu0 %v4095_v23 }
 0x111   : > { %2430 = vmatprep.subr.bf16.mxu1 %v4098_v24 }
 0x113   : > { %2205 = vmatpush1.bf16.msra.mxu0 %v4093_v25  ;;  %v637_v25 = vld [vmem:[#allocation2 + $0x10] sm:$0xf] }
 0x114   : > { %2431 = vmatpush1.bf16.msra.mxu1 %v4096_v26  ;;  %2206 = vmatprep.subr.bf16.mxu0 %v4101_v27  ;;  %v638_v26 = vld [vmem:[#allocation2 + $0x14] sm:$0xf] }
 0x115   : > { %2432 = vmatprep.subr.bf16.mxu1 %v4104_v28 }
 0x117   : > { %2207 = vmatpush1.bf16.msra.mxu0 %v4099_v29 }
 0x118   : > { %2433 = vmatpush1.bf16.msra.mxu1 %v4102_v30  ;;  %2208 = vmatprep.subr.bf16.mxu0 %v4107_v35 }
 0x119   : > { %2434 = vmatprep.subr.bf16.mxu1 %v4110_v36 }
 0x11b   : > { %2209 = vmatpush1.bf16.msra.mxu0 %v4105_v37 }
 0x11c   : > { %2435 = vmatpush1.bf16.msra.mxu1 %v4108_v38  ;;  %2210 = vmatprep.subr.bf16.mxu0 %v4113_v39 }
 0x11d   : > { %2436 = vmatprep.subr.bf16.mxu1 %v4116_v40 }
 0x11f   : > { %2211 = vmatpush1.bf16.msra.mxu0 %v4111_v41 }
 0x120   : > { %2437 = vmatpush1.bf16.msra.mxu1 %v4114_v42  ;;  %2212 = vmatprep.subr.bf16.mxu0 %v4119_v43 }
 0x121   : > { %2438 = vmatprep.subr.bf16.mxu1 %v4122_v44 }
 0x123   : > { %2213 = vmatpush1.bf16.msra.mxu0 %v4117_v45  ;;  %v639_v45 = vld [vmem:[#allocation2 + $0x18] sm:$0xf] }
 0x124   : > { %2439 = vmatpush1.bf16.msra.mxu1 %v4120_v46  ;;  %v640_v46 = vld [vmem:[#allocation2 + $0x1c] sm:$0xf] }
 0x126   : > { %2215 = vmatmul.mubr.bf16.vlgmr.msra.gmra.mrb[12].mxu0 %v2012_v48 }
 0x127   : > { %2441 = vmatmul.mubr.bf16.vlgmr.msra.gmra.mrb[12].mxu1 %v2238_v31 }
 0x139   : > { %v860_v51 = vpop.f32.mrb[0].mxu0 }
 0x13a   : > { %v1086_v52 = vpop.f32.mrb[0].mxu1  ;;  %v862_v55 = vpop.f32.mrb[1].mxu0 }
 0x13b   : > { %v1088_v56 = vpop.f32.mrb[1].mxu1  ;;  %v2465_v57 = vcombine.low %v860_v51, %v862_v55  ;;  %v864_v32 = vpop.f32.mrb[2].mxu0 }
 0x13c   : > { %v2473_v58 = vcombine.low %v1086_v52, %v1088_v56  ;;  %v1090_v59 = vpop.f32.mrb[2].mxu1  ;;  %v865_v33 = vpop.f32.mrb[3].mxu0 }
 0x13d   : > { %v1091_v61 = vpop.f32.mrb[3].mxu1  ;;  %v2472_v62 = vrot.slane %v2465_v57, %v4767_v54 }
 0x13e   : > { %v2480_v63 = vrot.slane %v2473_v58, %v4767_v54 }
 0x13f   : > { %v2537_v0 = vadd.f32 %v2472_v62, %v633_v60 }
 0x140   : > { %v2538_v1 = vadd.f32 %v2480_v63, %v634_v53 }
 0x141   : > { %2545 = vst [vmem:[#allocation2] sm:$0xf] %v2537_v0 }
 0x142   : > { %2546 = vst [vmem:[#allocation2 + $0x4] sm:$0xf] %v2538_v1 }
 0x179   : > { %v1312_v47 = vpop.f32.mrb[4].mxu0 }
 0x17a   : > { %v1538_v2 = vpop.f32.mrb[4].mxu1  ;;  %v1314_v3 = vpop.f32.mrb[5].mxu0 }
 0x17b   : > { %v1540_v4 = vpop.f32.mrb[5].mxu1  ;;  %v2481_v5 = vcombine.low %v1312_v47, %v1314_v3  ;;  %v1316_v7 = vpop.f32.mrb[6].mxu0 }
 0x17c   : > { %v2489_v6 = vcombine.low %v1538_v2, %v1540_v4  ;;  %v1542_v8 = vpop.f32.mrb[6].mxu1  ;;  %v1317_v11 = vpop.f32.mrb[7].mxu0 }
 0x17d   : > { %v1543_v12 = vpop.f32.mrb[7].mxu1  ;;  %v2488_v13 = vrot.slane %v2481_v5, %v4767_v54 }
 0x17e   : > { %v2496_v14 = vrot.slane %v2489_v6, %v4767_v54 }
 0x17f   : > { %v2539_v15 = vadd.f32 %v2488_v13, %v635_v9 }
 0x180   : > { %v2540_v16 = vadd.f32 %v2496_v14, %v636_v10 }
 0x181   : > { %2547 = vst [vmem:[#allocation2 + $0x8] sm:$0xf] %v2539_v15 }
 0x182   : > { %2548 = vst [vmem:[#allocation2 + $0xc] sm:$0xf] %v2540_v16 }
 0x1b9   : > { %v1764_v17 = vpop.f32.mrb[8].mxu0 }
 0x1ba   : > { %v1990_v18 = vpop.f32.mrb[8].mxu1  ;;  %v1766_v19 = vpop.f32.mrb[9].mxu0 }
 0x1bb   : > { %v1992_v20 = vpop.f32.mrb[9].mxu1  ;;  %v2497_v21 = vcombine.low %v1764_v17, %v1766_v19  ;;  %v1768_v23 = vpop.f32.mrb[10].mxu0 }
 0x1bc   : > { %v2505_v22 = vcombine.low %v1990_v18, %v1992_v20  ;;  %v1994_v24 = vpop.f32.mrb[10].mxu1  ;;  %v1769_v27 = vpop.f32.mrb[11].mxu0 }
 0x1bd   : > { %v1995_v28 = vpop.f32.mrb[11].mxu1  ;;  %v2504_v29 = vrot.slane %v2497_v21, %v4767_v54 }
 0x1be   : > { %v2512_v30 = vrot.slane %v2505_v22, %v4767_v54 }
 0x1bf   : > { %v2541_v35 = vadd.f32 %v2504_v29, %v637_v25 }
 0x1c0   : > { %v2542_v36 = vadd.f32 %v2512_v30, %v638_v26 }
 0x1c1   : > { %2549 = vst [vmem:[#allocation2 + $0x10] sm:$0xf] %v2541_v35 }
 0x1c2   : > { %2550 = vst [vmem:[#allocation2 + $0x14] sm:$0xf] %v2542_v36 }
 0x1f9   : > { %v2216_v37 = vpop.f32.mrb[12].mxu0 }
 0x1fa   : > { %v2442_v38 = vpop.f32.mrb[12].mxu1  ;;  %v2218_v39 = vpop.f32.mrb[13].mxu0 }
 0x1fb   : > { %v2444_v40 = vpop.f32.mrb[13].mxu1  ;;  %v2513_v41 = vcombine.low %v2216_v37, %v2218_v39  ;;  %v2220_v43 = vpop.f32.mrb[14].mxu0 }
 0x1fc   : > { %v2521_v42 = vcombine.low %v2442_v38, %v2444_v40  ;;  %v2446_v44 = vpop.f32.mrb[14].mxu1  ;;  %v2221_v48 = vpop.f32.mrb[15].mxu0 }
 0x1fd   : > { %v2447_v31 = vpop.f32.mrb[15].mxu1  ;;  %v2520_v34 = vrot.slane %v2513_v41, %v4767_v54 }
 0x1fe   : > { %v2528_v49 = vrot.slane %v2521_v42, %v4767_v54 }
 0x1ff   : > { %v2543_v50 = vadd.f32 %v2520_v34, %v639_v45 }
 0x200   : > { %v2544_v51 = vadd.f32 %v2528_v49, %v640_v46 }
 0x201   : > { %2551 = vst [vmem:[#allocation2 + $0x18] sm:$0xf] %v2543_v50 }
 0x202   : > { %2552 = vst [vmem:[#allocation2 + $0x1c] sm:$0xf] %v2544_v51 }
 0x203 PF: > { %p3599_p5 = scmp.ne.s32.totalorder %s4285_s27, 1 }
 0x204   : > { %v4306_v52 = vmov (!%p3599_p5), 0.0   ;;  %v2557_v55 = vld [vmem:[#allocation2] sm:$0xf] (!%p3599_p5)  ;;  %v2558_v56 = vld [vmem:[#allocation2 + $0x4] sm:$0xf] (!%p3599_p5)  ;;  %vm4308_vm8 = vmmov (!%p3599_p5), 0  }
 0x205   : > { %2556 = sbr.rel (%p3599_p5) target bundleno = 857 (0x359), region = 56  ;;  %3629 = vmatprep.subr.bf16.mxu0 (!%p3599_p5), %v4306_v52  ;;  %3635 = vmatprep.subr.bf16.mxu1 (!%p3599_p5), %v4306_v52  ;;  %v2559_v57 = vld [vmem:[#allocation2 + $0x8] sm:$0xf] (!%p3599_p5)  ;;  %v2560_v58 = vld [vmem:[#allocation2 + $0xc] sm:$0xf] (!%p3599_p5)  ;;  %v4780_v53 = vmul.f32 (!%p3599_p5), 0.5, %v2557_v55 }
 0x206   : > { %v2561_v32 = vld [vmem:[#allocation2 + $0x10] sm:$0xf] (!%p3599_p5)  ;;  %v2562_v59 = vld [vmem:[#allocation2 + $0x14] sm:$0xf] (!%p3599_p5)  ;;  %v4782_v33 = vmul.f32 (!%p3599_p5), 0.5, %v2558_v56  ;;  %v4800_v4 = vmul.f32 (!%p3599_p5), 0.5, %v2559_v57  ;;  %3631 = vmatprep.mubr.msk.bf16.mxu0 (!%p3599_p5), %vm4308_vm8, %v4306_v52  ;;  %3637 = vmatprep.mubr.msk.bf16.mxu1 (!%p3599_p5), %vm4308_vm8, %v4306_v52 }
 0x207   : > { %v4784_v61 = vmul.f32 (!%p3599_p5), 0.70710677, %v2557_v55  ;;  %v4786_v62 = vmul.f32 (!%p3599_p5), 0.70710677, %v2558_v56  ;;  %v4788_v63 = vmul.f32 (!%p3599_p5), 0.70710677, %v2559_v57 }
 0x208   : > { %v2563_v54 = vld [vmem:[#allocation2 + $0x18] sm:$0xf] (!%p3599_p5)  ;;  %v4790_v0 = vmul.f32 (!%p3599_p5), 0.70710677, %v2560_v58  ;;  %v4792_v1 = vmul.f32 (!%p3599_p5), 0.70710677, %v2561_v32 }
 0x209   : > { %v2564_v60 = vld [vmem:[#allocation2 + $0x1c] sm:$0xf] (!%p3599_p5)  ;;  %v4794_v47 = vmul.f32 (!%p3599_p5), 0.70710677, %v2562_v59  ;;  %v4796_v2 = vmul.f32 (!%p3599_p5), 0.70710677, %v2563_v54 }
 0x20a   : > { %v4798_v3 = vmul.f32 (!%p3599_p5), 0.70710677, %v2564_v60  ;;  %v4802_v5 = vmul.f32 (!%p3599_p5), 0.5, %v2560_v58  ;;  %v4804_v6 = vmul.f32 (!%p3599_p5), 0.5, %v2561_v32  ;;  %v4806_v7 = vmul.f32 (!%p3599_p5), 0.5, %v2562_v59 }
 0x20b   : > { %v4808_v8 = vmul.f32 (!%p3599_p5), 0.5, %v2563_v54  ;;  %v4810_v9 = vmul.f32 (!%p3599_p5), 0.5, %v2564_v60  ;;  %v2597_v10 = vand.u32 (!%p3599_p5), 2147483647, %v4784_v61  ;;  %v2598_v11 = vand.u32 (!%p3599_p5), 2147483647, %v4786_v62 }
 0x20c   : > { %v2599_v12 = vand.u32 2147483647, %v4788_v63  ;;  %v2600_v13 = vand.u32 2147483647, %v4790_v0  ;;  %v2601_v14 = vand.u32 2147483647, %v4792_v1 }
 0x20d   : > { %v2602_v15 = vand.u32 2147483647, %v4794_v47  ;;  %v2603_v16 = vand.u32 2147483647, %v4796_v2  ;;  %v2604_v17 = vand.u32 2147483647, %v4798_v3 }
 0x20e   : > { %v2605_v18 = vmul.f32 0.3275911, %v2597_v10  ;;  %v2606_v19 = vmul.f32 0.3275911, %v2598_v11  ;;  %v2607_v20 = vmul.f32 0.3275911, %v2599_v12 }
 0x20f   : > { %vm2581_vm0 = vcmp.ge.f32.partialorder %v4784_v61, 0.0  ;;  %vm2582_vm1 = vcmp.ge.f32.partialorder %v4786_v62, 0.0  ;;  %v2608_v21 = vmul.f32 0.3275911, %v2600_v13  ;;  %v2609_v22 = vmul.f32 0.3275911, %v2601_v14 }
 0x210   : > { %v2610_v23 = vmul.f32 0.3275911, %v2602_v15  ;;  %vm2583_vm2 = vcmp.ge.f32.partialorder %v4788_v63, 0.0  ;;  %vm2584_vm3 = vcmp.ge.f32.partialorder %v4790_v0, 0.0  ;;  %v2611_v24 = vmul.f32 0.3275911, %v2603_v16 }
 0x211   : > { %v2612_v25 = vmul.f32 0.3275911, %v2604_v17  ;;  %v2613_v26 = vadd.f32 1.0, %v2605_v18  ;;  %v2614_v27 = vadd.f32 1.0, %v2606_v19  ;;  %vm2585_vm4 = vcmp.ge.f32.partialorder %v4792_v1, 0.0  ;;  %v2777_v0 = vld [vmem:[%s5145_s3] sm:$0xff] }
 0x212   : > { %v2615_v28 = vadd.f32 1.0, %v2607_v20  ;;  %v2616_v29 = vadd.f32 1.0, %v2608_v21  ;;  %v2617_v30 = vadd.f32 1.0, %v2609_v22  ;;  %v2618_v35 = vadd.f32 1.0, %v2610_v23  ;;  %v2778_v1 = vld [vmem:[%s5145_s3 + $0x8] sm:$0xff] }
 0x213   : > { %v2619_v36 = vadd.f32 1.0, %v2611_v24  ;;  %4127 = vrcp.f32 %v2613_v26  ;;  %v2701_v37 = vsub.f32 0.0, %v2597_v10  ;;  %v2702_v38 = vsub.f32 0.0, %v2598_v11 }
 0x214   : > { %4129 = vrcp.f32 %v2614_v27  ;;  %v2703_v39 = vsub.f32 0.0, %v2599_v12  ;;  %v2704_v40 = vsub.f32 0.0, %v2600_v13  ;;  %v2620_v41 = vadd.f32 1.0, %v2612_v25 }
 0x215   : > { %4131 = vrcp.f32 %v2615_v28  ;;  %v2705_v42 = vsub.f32 0.0, %v2601_v14  ;;  %v2706_v43 = vsub.f32 0.0, %v2602_v15  ;;  %v2707_v44 = vsub.f32 0.0, %v2603_v16 }
 0x216   : > { %4133 = vrcp.f32 %v2616_v29  ;;  %v2709_v45 = vmul.f32 %v2701_v37, %v2597_v10  ;;  %v2710_v46 = vmul.f32 %v2702_v38, %v2598_v11  ;;  %v2708_v48 = vsub.f32 0.0, %v2604_v17 }
 0x217   : > { %4135 = vrcp.f32 %v2617_v30  ;;  %v2711_v31 = vmul.f32 %v2703_v39, %v2599_v12  ;;  %v2712_v34 = vmul.f32 %v2704_v40, %v2600_v13  ;;  %vm2586_vm5 = vcmp.ge.f32.partialorder %v4794_v47, 0.0 }
 0x218   : > { %vm2587_vm6 = vcmp.ge.f32.partialorder %v4796_v2, 0.0  ;;  %4137 = vrcp.f32 %v2618_v35  ;;  %v2713_v49 = vmul.f32 %v2705_v42, %v2601_v14  ;;  %v2714_v50 = vmul.f32 %v2706_v43, %v2602_v15  ;;  %v2780_v35 = vld [vmem:[%s5147_s5 + $0x8] sm:$0xff] }
 0x219   : > { %4139 = vrcp.f32 %v2619_v36  ;;  %v2717_v51 = vmul.f32 1.442695, %v2709_v45  ;;  %v2719_v55 = vmul.f32 1.442695, %v2710_v46  ;;  %vm2588_vm7 = vcmp.ge.f32.partialorder %v4798_v3, 0.0  ;;  %v2779_v3 = vld [vmem:[%s5147_s5] sm:$0xff] }
 0x21a   : > { %4141 = vrcp.f32 %v2620_v41  ;;  %v2715_v56 = vmul.f32 %v2707_v44, %v2603_v16  ;;  %v2721_v57 = vmul.f32 1.442695, %v2711_v31  ;;  %v4307_v58 = vmov -1.0  }
 0x21b   : > { %v4830_v32 = vsel %vm2581_vm0, 1.0, %v4307_v58  ;;  %v4834_v59 = vsel %vm2582_vm1, 1.0, %v4307_v58  ;;  %v2716_v54 = vmul.f32 %v2708_v48, %v2604_v17  ;;  %v2723_v60 = vmul.f32 1.442695, %v2712_v34 }
 0x21c   : > { %v4838_v10 = vsel %vm2583_vm2, 1.0, %v4307_v58  ;;  %v4842_v11 = vsel %vm2584_vm3, 1.0, %v4307_v58  ;;  %4143 = vpow2.f32 %v2717_v51  ;;  %v2725_v12 = vmul.f32 1.442695, %v2713_v49 }
 0x21d   : > { %v4844_v13 = vpop.eup %4127  ;;  %v4848_v61 = vsel %vm2585_vm4, 1.0, %v4307_v58  ;;  %v4852_v62 = vsel %vm2586_vm5, 1.0, %v4307_v58  ;;  %4145 = vpow2.f32 %v2719_v55  ;;  %v2727_v63 = vmul.f32 1.442695, %v2714_v50 }
 0x21e   : > { %v4857_v14 = vpop.eup %4129  ;;  %v2629_v15 = vmul.f32 1.0614054, %v4844_v13  ;;  %4147 = vpow2.f32 %v2721_v57  ;;  %v2729_v16 = vmul.f32 1.442695, %v2715_v56  ;;  %v2731_v18 = vmul.f32 1.442695, %v2716_v54 }
 0x21f   : > { %v4863_v17 = vpop.eup %4131  ;;  %v2630_v47 = vmul.f32 1.0614054, %v4857_v14  ;;  %4149 = vpow2.f32 %v2723_v60  ;;  %v4874_v20 = vsel %vm2587_vm6, 1.0, %v4307_v58  ;;  %v4309_v23 = vmov 0  }
 0x220   : > { %v4870_v19 = vpop.eup %4133  ;;  %v2631_v21 = vmul.f32 1.0614054, %v4863_v17  ;;  %v2637_v22 = vadd.f32 -1.4531521, %v2629_v15  ;;  %4151 = vpow2.f32 %v2725_v12  ;;  %4124 = vset.pattern.permute.xlu1 %v4309_v23  ;;  %4123 = vset.pattern.permute.xlu0 %v4309_v23  ;;  %v4881_v25 = vsel %vm2588_vm7, 1.0, %v4307_v58 }
 0x221   : > { %v4877_v24 = vpop.eup %4135  ;;  %v2632_v26 = vmul.f32 1.0614054, %v4870_v19  ;;  %v2638_v27 = vadd.f32 -1.4531521, %v2630_v47  ;;  %4153 = vpow2.f32 %v2727_v63  ;;  %2823 = vperm.xlu1 %4124, %v2777_v0   ;;  %2828 = vperm.xlu0 %4123, %v2778_v1   ;;  %vm2853_vm9 = vcmask 1041409  }
 0x222   : > { %v4884_v2 = vpop.eup %4137  ;;  %v2633_v28 = vmul.f32 1.0614054, %v4877_v24  ;;  %v2639_v29 = vadd.f32 -1.4531521, %v2631_v21  ;;  %v2645_v30 = vmul.f32 %v4844_v13, %v2637_v22  ;;  %4155 = vpow2.f32 %v2729_v16 }
 0x223   : > { %v4894_v36 = vpop.eup %4139  ;;  %v2634_v37 = vmul.f32 1.0614054, %v4884_v2  ;;  %v2640_v38 = vadd.f32 -1.4531521, %v2632_v26  ;;  %v2646_v39 = vmul.f32 %v4857_v14, %v2638_v27  ;;  %4157 = vpow2.f32 %v2731_v18 }
 0x224   : > { %v4898_v40 = vpop.eup %4141  ;;  %v2635_v41 = vmul.f32 1.0614054, %v4894_v36  ;;  %v2641_v42 = vadd.f32 -1.4531521, %v2633_v28  ;;  %v2647_v43 = vmul.f32 %v4863_v17, %v2639_v29  ;;  %v2653_v44 = vadd.f32 1.4214138, %v2645_v30 }
 0x225   : > { %v2636_v45 = vmul.f32 1.0614054, %v4898_v40  ;;  %v2642_v46 = vadd.f32 -1.4531521, %v2634_v37  ;;  %v2648_v48 = vmul.f32 %v4870_v19, %v2640_v38  ;;  %v2654_v31 = vadd.f32 1.4214138, %v2646_v39  ;;  %2925 = vperm.xlu1 %4124, %v2779_v3   ;;  %2930 = vperm.xlu0 %4123, %v2780_v35  }
 0x226   : > { %v4144_v34 = vpop.eup %4143  ;;  %v2643_v49 = vadd.f32 -1.4531521, %v2635_v41  ;;  %v2649_v50 = vmul.f32 %v4877_v24, %v2641_v42  ;;  %v2655_v51 = vadd.f32 1.4214138, %v2647_v43  ;;  %v2661_v55 = vmul.f32 %v4844_v13, %v2653_v44 }
 0x227   : > { %v4146_v56 = vpop.eup %4145  ;;  %v2644_v57 = vadd.f32 -1.4531521, %v2636_v45  ;;  %v2650_v58 = vmul.f32 %v4884_v2, %v2642_v46  ;;  %v2656_v54 = vadd.f32 1.4214138, %v2648_v48  ;;  %v2662_v60 = vmul.f32 %v4857_v14, %v2654_v31 }
 0x228   : > { %v4148_v12 = vpop.eup %4147  ;;  %v2651_v63 = vmul.f32 %v4894_v36, %v2643_v49  ;;  %v2657_v0 = vadd.f32 1.4214138, %v2649_v50  ;;  %v2663_v15 = vmul.f32 %v4863_v17, %v2655_v51  ;;  %v2669_v16 = vadd.f32 -0.28449672, %v2661_v55 }
 0x229   : > { %v4150_v1 = vpop.eup %4149  ;;  %v2652_v47 = vmul.f32 %v4898_v40, %v2644_v57  ;;  %v2658_v18 = vadd.f32 1.4214138, %v2650_v58  ;;  %v2664_v21 = vmul.f32 %v4870_v19, %v2656_v54  ;;  %v2670_v22 = vadd.f32 -0.28449672, %v2662_v60 }
 0x22a   : > { %v4152_v23 = vpop.eup %4151  ;;  %v2659_v26 = vadd.f32 1.4214138, %v2651_v63  ;;  %v2665_v27 = vmul.f32 %v4877_v24, %v2657_v0  ;;  %v2671_v28 = vadd.f32 -0.28449672, %v2663_v15  ;;  %v2677_v29 = vmul.f32 %v4844_v13, %v2669_v16 }
 0x22b   : > { %v4154_v30 = vpop.eup %4153  ;;  %v2660_v3 = vadd.f32 1.4214138, %v2652_v47  ;;  %v2666_v35 = vmul.f32 %v4884_v2, %v2658_v18  ;;  %v2672_v37 = vadd.f32 -0.28449672, %v2664_v21  ;;  %v2678_v38 = vmul.f32 %v4857_v14, %v2670_v22 }
 0x22c   : > { %v4156_v39 = vpop.eup %4155  ;;  %v2667_v41 = vmul.f32 %v4894_v36, %v2659_v26  ;;  %v2673_v42 = vadd.f32 -0.28449672, %v2665_v27  ;;  %v2679_v43 = vmul.f32 %v4863_v17, %v2671_v28  ;;  %v2685_v44 = vadd.f32 0.2548296, %v2677_v29 }
 0x22d   : > { %v4158_v45 = vpop.eup %4157  ;;  %v2668_v46 = vmul.f32 %v4898_v40, %v2660_v3  ;;  %v2674_v48 = vadd.f32 -0.28449672, %v2666_v35  ;;  %v2680_v31 = vmul.f32 %v4870_v19, %v2672_v37  ;;  %v2686_v49 = vadd.f32 0.2548296, %v2678_v38 }
 0x22e   : > { %v2675_v50 = vadd.f32 -0.28449672, %v2667_v41  ;;  %v2681_v51 = vmul.f32 %v4877_v24, %v2673_v42  ;;  %v2687_v55 = vadd.f32 0.2548296, %v2679_v43  ;;  %v2693_v57 = vmul.f32 %v4844_v13, %v2685_v44 }
 0x22f   : > { %v2676_v58 = vadd.f32 -0.28449672, %v2668_v46  ;;  %v2682_v54 = vmul.f32 %v4884_v2, %v2674_v48  ;;  %v2688_v60 = vadd.f32 0.2548296, %v2680_v31  ;;  %v2694_v63 = vmul.f32 %v4857_v14, %v2686_v49 }
 0x230   : > { %v2683_v0 = vmul.f32 %v4894_v36, %v2675_v50  ;;  %v2689_v15 = vadd.f32 0.2548296, %v2681_v51  ;;  %v2695_v16 = vmul.f32 %v4863_v17, %v2687_v55  ;;  %v2733_v47 = vmul.f32 %v4144_v34, %v2693_v57 }
 0x231   : > { %v2684_v18 = vmul.f32 %v4898_v40, %v2676_v58  ;;  %v2690_v21 = vadd.f32 0.2548296, %v2682_v54  ;;  %v2696_v22 = vmul.f32 %v4870_v19, %v2688_v60  ;;  %v2734_v26 = vmul.f32 %v4146_v56, %v2694_v63 }
 0x232   : > { %v2691_v27 = vadd.f32 0.2548296, %v2683_v0  ;;  %v2697_v13 = vmul.f32 %v4877_v24, %v2689_v15  ;;  %v2735_v28 = vmul.f32 %v4148_v12, %v2695_v16  ;;  %v2741_v29 = vsub.f32 1.0, %v2733_v47 }
 0x233   : > { %v2692_v3 = vadd.f32 0.2548296, %v2684_v18  ;;  %v2698_v14 = vmul.f32 %v4884_v2, %v2690_v21  ;;  %v2736_v35 = vmul.f32 %v4150_v1, %v2696_v22  ;;  %v2742_v37 = vsub.f32 1.0, %v2734_v26 }
 0x234   : > { %v2699_v38 = vmul.f32 %v4894_v36, %v2691_v27  ;;  %v2737_v17 = vmul.f32 %v4152_v23, %v2697_v13  ;;  %v2743_v34 = vsub.f32 1.0, %v2735_v28  ;;  %v2749_v41 = vmul.f32 %v2741_v29, %v4830_v32 }
 0x235   : > { %v2700_v42 = vmul.f32 %v4898_v40, %v2692_v3  ;;  %v2738_v19 = vmul.f32 %v4154_v30, %v2698_v14  ;;  %v2744_v56 = vsub.f32 1.0, %v2736_v35  ;;  %v2750_v43 = vmul.f32 %v2742_v37, %v4834_v59 }
 0x236   : > { %v2739_v24 = vmul.f32 %v4156_v39, %v2699_v38  ;;  %v2745_v12 = vsub.f32 1.0, %v2737_v17  ;;  %v2751_v44 = vmul.f32 %v2743_v34, %v4838_v10  ;;  %v2757_v46 = vadd.f32 1.0, %v2749_v41 }
 0x237   : > { %v2740_v2 = vmul.f32 %v4158_v45, %v2700_v42  ;;  %v2746_v1 = vsub.f32 1.0, %v2738_v19  ;;  %v2752_v36 = vmul.f32 %v2744_v56, %v4842_v11  ;;  %v2758_v23 = vadd.f32 1.0, %v2750_v43 }
 0x238   : > { %vm2856_vm10 = vcmask 1042434   ;;  %v2747_v48 = vsub.f32 1.0, %v2739_v24  ;;  %v2753_v32 = vmul.f32 %v2745_v12, %v4848_v61  ;;  %v2759_v40 = vadd.f32 1.0, %v2751_v44 }
 0x239   : > { %v4938_v30 = vmul.f32 %v2757_v46, %v4780_v53  ;;  %vm2859_vm11 = vcmask 1043459   ;;  %v2748_v59 = vsub.f32 1.0, %v2740_v2  ;;  %v2754_v39 = vmul.f32 %v2746_v1, %v4852_v62 }
 0x23a   : > { %v2760_v10 = vadd.f32 1.0, %v2752_v36  ;;  %v2766_v31 = vmul.f32 %v2758_v23, %v4782_v33  ;;  %vm2862_vm12 = vcmask 1044484   ;;  %v2755_v45 = vmul.f32 %v2747_v48, %v4874_v20 }
 0x23b   : > { %v2761_v11 = vadd.f32 1.0, %v2753_v32  ;;  %v2767_v49 = vmul.f32 %v2759_v40, %v4800_v4  ;;  %v2781_v61 = vpack.c.bf16 %v4938_v30, %v4938_v30  ;;  %vm2865_vm13 = vcmask 1045509  }
 0x23c   : > { %v2756_v53 = vmul.f32 %v2748_v59, %v4881_v25  ;;  %v2762_v50 = vadd.f32 1.0, %v2754_v39  ;;  %v2768_v51 = vmul.f32 %v2760_v10, %v4802_v5  ;;  %v2782_v55 = vpack.c.bf16 %v2766_v31, %v2766_v31 }
 0x23d   : > { %vm2868_vm14 = vcmask 1046534   ;;  %v2763_v62 = vadd.f32 1.0, %v2755_v45  ;;  %v2769_v33 = vmul.f32 %v2761_v11, %v4804_v6  ;;  %v2783_v57 = vpack.c.bf16 %v2767_v49, %v2767_v49 }
 0x23e   : > { %v4949_v58 = vunpack.c.l.b16 %v2781_v61  ;;  %vm2871_vm15 = vcmask 1047559   ;;  %v2764_v20 = vadd.f32 1.0, %v2756_v53  ;;  %v2770_v4 = vmul.f32 %v2762_v50, %v4806_v7  ;;  %v4125_v50 = vld [vmem:[%s5144_s2] sm:$0xff]  }
 0x23f   : > { %v2784_v54 = vpack.c.bf16 %v2768_v51, %v2768_v51  ;;  %v4952_v60 = vunpack.c.l.b16 %v2782_v55  ;;  %v2771_v25 = vmul.f32 %v2763_v62, %v4808_v8  ;;  %v2785_v63 = vpack.c.bf16 %v2769_v33, %v2769_v33 }
 0x240   : > { %v4955_v0 = vunpack.c.l.b16 %v2783_v57  ;;  %v3032_v5 = vrot.slane %v4949_v58, 1  ;;  %v2772_v15 = vmul.f32 %v2764_v20, %v4810_v9  ;;  %v2786_v6 = vpack.c.bf16 %v2770_v4, %v2770_v4 }
 0x241   : > { %v4959_v16 = vunpack.c.l.b16 %v2784_v54  ;;  %v2852_v47 = vrot.slane %v4952_v60, 7  ;;  %vm2878_vm0 = vcmask 1043456   ;;  %v2787_v18 = vpack.c.bf16 %v2771_v25, %v2771_v25 }
 0x242   : > { %v4962_v7 = vunpack.c.l.b16 %v2785_v63  ;;  %v2855_v21 = vrot.slane %v4955_v0, 6  ;;  %v2797_v8 = vrot.slane %v4938_v30, 2  ;;  %v2788_v22 = vpack.c.bf16 %v2772_v15, %v2772_v15 }
 0x243   : > { %v4966_v26 = vunpack.c.l.b16 %v2786_v6  ;;  %v2854_v27 = vsel %vm2853_vm9, %v2852_v47, %v4949_v58  ;;  %v2858_v9 = vrot.slane %v4959_v16, 5  ;;  %v4971_v13 = vunpack.c.l.b16 %v2787_v18 }
 0x244   : > { %v2857_v28 = vsel %vm2856_vm10, %v2855_v21, %v2854_v27  ;;  %v2861_v29 = vrot.slane %v4962_v7, 4  ;;  %v2798_v3 = vrot.slane %v2766_v31, 2  ;;  %v4975_v14 = vunpack.c.l.b16 %v2788_v22 }
 0x245   : > { %v2860_v35 = vsel %vm2859_vm11, %v2858_v9, %v2857_v28  ;;  %v2864_v37 = vrot.slane %v4966_v26, 3  ;;  %v2799_v38 = vrot.slane %v2767_v49, 2  ;;  %vm2874_vm1 = vcmask 64512  }
 0x246   : > { %v2863_v17 = vsel %vm2862_vm12, %v2861_v29, %v2860_v35  ;;  %v2867_v34 = vrot.slane %v4971_v13, 2  ;;  %v2800_v41 = vrot.slane %v2768_v51, 2  ;;  %v2801_v42 = vrot.slane %v2769_v33, 2 }
 0x247   : > { %v2866_v19 = vsel %vm2865_vm13, %v2864_v37, %v2863_v17  ;;  %v2870_v56 = vrot.slane %v4975_v14, 1  ;;  %v2802_v43 = vrot.slane %v2770_v4, 2  ;;  %v2803_v24 = vrot.slane %v2771_v25, 2 }
 0x248   : > { %v2869_v12 = vsel %vm2868_vm14, %v2867_v34, %v2866_v19  ;;  %v2804_v44 = vrot.slane %v2772_v15, 2  ;;  %v2813_v46 = vpack.c.bf16 %v2797_v8, %v2797_v8  ;;  %v2814_v2 = vpack.c.bf16 %v2798_v3, %v2798_v3 }
 0x249   : > { %v2872_v1 = vsel %vm2871_vm15, %v2870_v56, %v2869_v12  ;;  %v2815_v36 = vpack.c.bf16 %v2799_v38, %v2799_v38  ;;  %v2816_v23 = vpack.c.bf16 %v2800_v41, %v2800_v41  ;;  %v2817_v48 = vpack.c.bf16 %v2801_v42, %v2801_v42 }
 0x24a   : > { %v2873_v32 = vpack.c.b16 %v2872_v1, %v2872_v1  ;;  %v2818_v40 = vpack.c.bf16 %v2802_v43, %v2802_v43  ;;  %v2819_v30 = vpack.c.bf16 %v2803_v24, %v2803_v24  ;;  %v2820_v59 = vpack.c.bf16 %v2804_v44, %v2804_v44  ;;  %v4126_v44 = vld [vmem:[%s5146_s4] sm:$0xff]  }
 0x24b   : > { %v2946_v39 = vunpack.c.l.b16 %v2813_v46  ;;  %v2947_v10 = vunpack.c.l.b16 %v2814_v2  ;;  %v2948_v31 = vunpack.c.l.b16 %v2815_v36  ;;  %v2949_v45 = vunpack.c.l.b16 %v2816_v23 }
 0x24c   : > { %v2880_v11 = vsel %vm2878_vm0, %v2873_v32, 0  ;;  %v2950_v49 = vunpack.c.l.b16 %v2817_v48  ;;  %v2951_v61 = vunpack.c.l.b16 %v2818_v40  ;;  %v2952_v53 = vunpack.c.l.b16 %v2819_v30 }
 0x24d   : > { %3630 = vmatpush3.bf16.msra.mxu0 %v2880_v11  ;;  %v2953_v51 = vunpack.c.l.b16 %v2820_v59  ;;  %v2954_v55 = vrot.slane %v2947_v10, 7  ;;  %v2956_v62 = vrot.slane %v2948_v31, 6  ;;  %v2958_v33 = vrot.slane %v2949_v45, 5 }
 0x24e   : > { %v2960_v57 = vrot.slane %v2950_v49, 4  ;;  %v2962_v20 = vrot.slane %v2951_v61, 3  ;;  %v2964_v4 = vrot.slane %v2952_v53, 2  ;;  %v3091_v54 = vrot.slane %v2946_v39, 1  ;;  %3641 = vmatprep.subr.bf16.mxu0 %v4306_v52 }
 0x24f   : > { %v2955_v25 = vsel %vm2853_vm9, %v2954_v55, %v2946_v39  ;;  %v2966_v63 = vrot.slane %v2953_v51, 1  ;;  %v3033_v15 = vsel %vm2853_vm9, %v4952_v60, %v3032_v5  ;;  %v3034_v6 = vrot.slane %v4955_v0, 7 }
 0x250   : > { %v2957_v47 = vsel %vm2856_vm10, %v2956_v62, %v2955_v25  ;;  %3632 = vmatmul.mubr.msk.bf16.vlgmr.msra.gmra.mrb[0].mxu0 %vm2874_vm1, %v4125_v50  ;;  %v3036_v18 = vrot.slane %v4959_v16, 6  ;;  %v3038_v21 = vrot.slane %v4962_v7, 5  ;;  %v3040_v8 = vrot.slane %v4966_v26, 4 }
 0x251   : > { %v2959_v22 = vsel %vm2859_vm11, %v2958_v33, %v2957_v47  ;;  %v3035_v27 = vsel %vm2856_vm10, %v3034_v6, %v3033_v15  ;;  %v3042_v58 = vrot.slane %v4971_v13, 3  ;;  %v3044_v60 = vrot.slane %v4975_v14, 2  ;;  %3643 = vmatprep.mubr.msk.bf16.mxu0 %vm4308_vm8, %v4306_v52 }
 0x252   : > { %v2961_v0 = vsel %vm2862_vm12, %v2960_v57, %v2959_v22  ;;  %v3037_v5 = vsel %vm2859_vm11, %v3036_v18, %v3035_v27  ;;  %v3092_v16 = vsel %vm2853_vm9, %v2947_v10, %v3091_v54  ;;  %v3093_v7 = vrot.slane %v2948_v31, 7 }
 0x253   : > { %v2963_v26 = vsel %vm2865_vm13, %v2962_v20, %v2961_v0  ;;  %v3039_v9 = vsel %vm2862_vm12, %v3038_v21, %v3037_v5  ;;  %v3095_v28 = vrot.slane %v2949_v45, 6  ;;  %v3097_v29 = vrot.slane %v2950_v49, 5 }
 0x254   : > { %v2965_v13 = vsel %vm2868_vm14, %v2964_v4, %v2963_v26  ;;  %v3041_v3 = vsel %vm2865_vm13, %v3040_v8, %v3039_v9  ;;  %v3094_v14 = vsel %vm2856_vm10, %v3093_v7, %v3092_v16  ;;  %v3099_v35 = vrot.slane %v2951_v61, 4 }
 0x255   : > { %v2967_v37 = vsel %vm2871_vm15, %v2966_v63, %v2965_v13  ;;  %v3043_v38 = vsel %vm2868_vm14, %v3042_v58, %v3041_v3  ;;  %v3096_v17 = vsel %vm2859_vm11, %v3095_v28, %v3094_v14  ;;  %v3101_v34 = vrot.slane %v2952_v53, 3 }
 0x256   : > { %v2968_v41 = vpack.c.b16 %v2967_v37, %v2967_v37  ;;  %v3045_v42 = vsel %vm2871_vm15, %v3044_v60, %v3043_v38  ;;  %v3098_v19 = vsel %vm2862_vm12, %v3097_v29, %v3096_v17  ;;  %v3103_v56 = vrot.slane %v2953_v51, 2 }
 0x257   : > { %v3046_v43 = vpack.c.b16 %v3045_v42, %v3045_v42  ;;  %v3100_v24 = vsel %vm2865_vm13, %v3099_v35, %v3098_v19 }
 0x258   : > { %v2973_v12 = vsel %vm2878_vm0, %v2968_v41, 0  ;;  %v3102_v46 = vsel %vm2868_vm14, %v3101_v34, %v3100_v24 }
 0x259   : > { %3636 = vmatpush3.bf16.msra.mxu1 %v2973_v12  ;;  %v3048_v2 = vsel %vm2878_vm0, %v3046_v43, 0  ;;  %v3104_v1 = vsel %vm2871_vm15, %v3103_v56, %v3102_v46 }
 0x25a   : > { %3647 = vmatprep.subr.bf16.mxu1 %v4306_v52  ;;  %3642 = vmatpush3.bf16.msra.mxu0 %v3048_v2  ;;  %v3105_v36 = vpack.c.b16 %v3104_v1, %v3104_v1 }
 0x25c   : > { %3638 = vmatmul.mubr.msk.bf16.vlgmr.msra.gmra.mrb[0].mxu1 %vm2874_vm1, %v4126_v44  ;;  %v3107_v23 = vsel %vm2878_vm0, %v3105_v36, 0 }
 0x25d   : > { %3648 = vmatpush3.bf16.msra.mxu1 %v3107_v23  ;;  %3644 = vmatmul.mubr.msk.bf16.vlgmr.msra.gmra.mrb[4].mxu0 %vm2874_vm1, %v4125_v50 }
 0x25e   : > { %3649 = vmatprep.mubr.msk.bf16.mxu1 %vm4308_vm8, %v4306_v52 }
 0x264   : > { %3650 = vmatmul.mubr.msk.bf16.vlgmr.msra.gmra.mrb[4].mxu1 %vm2874_vm1, %v4126_v44 }
 0x2a0   : > { %v2829_v40 = vpop.permute.xlu0 %2828  ;;  %v2824_v18 = vpop.permute.xlu1 %2823 }
 0x2a4   : > { %v2931_v45 = vpop.permute.xlu0 %2930  ;;  %v2926_v16 = vpop.permute.xlu1 %2925 }
 0x323   : > { %v2916_v48 = vpop.f32.mrb[0].mxu0 }
 0x324   : > { %v3633_v32 = vpop.f32.mrb[1].mxu0  ;;  %v2917_v8 = vadd.f32 %v2916_v48, %v2824_v18 }
 0x325   : > { %v2919_v30 = vpop.f32.mrb[2].mxu0 }
 0x326   : > { %v2920_v59 = vadd.f32 %v2919_v30, %v2829_v40  ;;  %v3634_v39 = vpop.f32.mrb[3].mxu0 }
 0x328   : > { %v3604_v10 = vmul.f32 -1.442695, %v2920_v59 }
 0x32a   : > { %4159 = vpow2.f32 %v3604_v10 }
 0x32f   : > { %v3009_v31 = vpop.f32.mrb[0].mxu1 }
 0x330   : > { %v3639_v11 = vpop.f32.mrb[1].mxu1  ;;  %v3084_v49 = vpop.f32.mrb[4].mxu0  ;;  %v3010_v26 = vadd.f32 %v3009_v31, %v2926_v16 }
 0x331   : > { %v3012_v61 = vpop.f32.mrb[2].mxu1  ;;  %v3645_v53 = vpop.f32.mrb[5].mxu0  ;;  %v3085_v29 = vadd.f32 %v3084_v49, %v2824_v18 }
 0x332   : > { %v3013_v50 = vadd.f32 %v3012_v61, %v2931_v45  ;;  %v3640_v51 = vpop.f32.mrb[3].mxu1  ;;  %v3087_v55 = vpop.f32.mrb[6].mxu0 }
 0x333   : > { %v3088_v52 = vadd.f32 %v3087_v55, %v2829_v40  ;;  %v3646_v62 = vpop.f32.mrb[7].mxu0 }
 0x334   : > { %v4160_v33 = vpop.eup %4159  ;;  %v3605_v57 = vmul.f32 -1.442695, %v3013_v50 }
 0x335   : > { %v3019_v20 = vadd.f32 1.0, %v4160_v33  ;;  %v3608_v4 = vmul.f32 -1.442695, %v3088_v52 }
 0x336   : > { %4161 = vpow2.f32 %v3605_v57 }
 0x337   : > { %4163 = vrcp.f32 %v3019_v20  ;;  %v3143_v54 = vpop.f32.mrb[4].mxu1 }
 0x338   : > { %4165 = vpow2.f32 %v3608_v4  ;;  %v3651_v25 = vpop.f32.mrb[5].mxu1  ;;  %v3144_v14 = vadd.f32 %v3143_v54, %v2926_v16 }
 0x339   : > { %v3146_v63 = vpop.f32.mrb[6].mxu1 }
 0x33a   : > { %v3147_v15 = vadd.f32 %v3146_v63, %v2931_v45  ;;  %v3652_v6 = vpop.f32.mrb[7].mxu1 }
 0x33c   : > { %v3610_v47 = vmul.f32 -1.442695, %v3147_v15 }
 0x33e   : > { %4167 = vpow2.f32 %v3610_v47 }
 0x340   : > { %v4162_v21 = vpop.eup %4161 }
 0x341   : > { %v4164_v22 = vpop.eup %4163  ;;  %v3027_v27 = vadd.f32 1.0, %v4162_v21 }
 0x342   : > { %v4166_v58 = vpop.eup %4165  ;;  %v3022_v60 = vmul.f32 %v4164_v22, %v2917_v8 }
 0x343   : > { %4169 = vrcp.f32 %v3027_v27  ;;  %v3153_v0 = vadd.f32 1.0, %v4166_v58 }
 0x344   : > { %3023 = vst [vmem:[%s4444_s30] sm:$0xff] %v3022_v60 }
 0x345   : > { %4171 = vrcp.f32 %v3153_v0 }
 0x348   : > { %v4168_v5 = vpop.eup %4167 }
 0x349   : > { %v3162_v7 = vadd.f32 1.0, %v4168_v5 }
 0x34b   : > { %4173 = vrcp.f32 %v3162_v7 }
 0x34d   : > { %v4170_v9 = vpop.eup %4169 }
 0x34e   : > { %v3030_v28 = vmul.f32 %v4170_v9, %v3010_v26 }
 0x34f   : > { %v4172_v13 = vpop.eup %4171 }
 0x350   : > { %3031 = vst [vmem:[%s4446_s29] sm:$0xff] %v3030_v28  ;;  %v3156_v3 = vmul.f32 %v4172_v13, %v3085_v29 }
 0x352   : > { %3609 = vst [vmem:[%s4444_s30 + $0x8] sm:$0xff] %v3156_v3 }
 0x355   : > { %v4174_v35 = vpop.eup %4173 }
 0x356   : > { %v3165_v37 = vmul.f32 %v4174_v35, %v3144_v14 }
 0x358   : > { %3611 = vst [vmem:[%s4446_s29 + $0x8] sm:$0xff] %v3165_v37 }
 0x359 PF: > { %s3614_s27 = sshll.u32 %s4289_s28, 7  ;;  %s3186_s20 = sshll.u32 %s4444_s30, 4  ;;  %s5048_s20 = int_to_ptr.vmem [resolvable:$true] %s3186_s20 }
 0x35a   : > { %s5045_s19 = scalar_lea.hbm %s5148_s6, %s3614_s27  ;;  %s3169_s21 = scalar_lea.sflag [#allocation4], %s4425_s18 }
 0x35b   : > { %s4175_s22 = scalar_lea.vmem %s5048_s20, 256  ;;  %s4310_s23 = smov [#allocation3]  }
 0x35c   : > { %p4176_p6 = scmp.ne.s32.totalorder %s5048_s20, %s4175_s22  ;;  %s4179_s9 = sshll.u32 %s4310_s23, 4  ;;  %s4180_s9 = int_to_ptr.vmem [resolvable:$false] %s4179_s9 }
 0x35d   : > { %s4181_s10 = scalar_lea.vmem %s4180_s9, 512  ;;  %p4182_p10 = scmp.lt.s32.totalorder %s5048_s20, %s4180_s9 }
 0x35e   : > { %p4177_p7 = pnand %p4176_p6, %p4404_p3  ;;  %p4183_p11 = scmp.lt.s32.totalorder %s4181_s10, %s4175_s22 }
 0x360   : > { %p4178_p8 = pneg %p4177_p7  ;;  %p4184_p12 = por %p4183_p11, %p4182_p10 }
 0x362   : > { %p4185_p13 = pnand %p4184_p12, %p4178_p8 }
 0x364   : > { %4188 = shalt.err (!%p4185_p13)
}
 0x365   : > { %s4189_s30 = scalar_lea.hbm %s5045_s19, 256  ;;  %s4193_s11 = scalar_lea.hbm %s5148_s6, 512 }
 0x366   : > { %p4190_p0 = scmp.ne.s32.totalorder %s5045_s19, %s4189_s30  ;;  %p4194_p4 = scmp.lt.u32.totalorder %s5045_s19, %s5148_s6 }
 0x367   : > { %p4195_p5 = scmp.lt.u32.totalorder %s4193_s11, %s4189_s30  ;;  %p4197_p7 = scmp.lt.u32.totalorder %s4189_s30, %s5045_s19 }
 0x368   : > { %p4191_p1 = pnand %p4190_p0, %p4404_p3 }
 0x369   : > { %p4196_p6 = por %p4195_p5, %p4194_p4 }
 0x36a   : > { %p4192_p2 = pneg %p4191_p1 }
 0x36b   : > { %p4198_p8 = por %p4197_p7, %p4196_p6 }
 0x36d   : > { %p4199_p10 = pnand %p4198_p8, %p4192_p2 }
 0x36f   : > { %4202 = shalt.err (!%p4199_p10)
}
 0x370   : > { %s4311_s22 = smov 128   ;;  %s4312_s9 = smov 256  }
 0x371   : > { %s4313_s10 = smov 8   ;;  %s5082_s16 = scalar_lea.hbm %s5149_s7, %s3614_s27 }
 0x372   : > { %3653 = dma.vmem_to_hbm [thread:$0]  (%p4404_p3), %s5048_s20, 256, %s5045_s19, %s3169_s21, %s4311_s22, %s4312_s9, %s4313_s10  }
 0x373   : > { %s3201_s11 = sshll.u32 %s4446_s29, 4  ;;  %s3174_s12 = scalar_lea.sflag [#allocation6], %s4425_s18  ;;  %s5085_s11 = int_to_ptr.vmem [resolvable:$true] %s3201_s11 }
 0x374   : > { %s4203_s23 = scalar_lea.vmem %s5085_s11, 256  ;;  %s4314_s0 = smov [#allocation5]  }
 0x375   : > { %p4204_p11 = scmp.ne.s32.totalorder %s5085_s11, %s4203_s23  ;;  %s4207_s19 = sshll.u32 %s4314_s0, 4  ;;  %s4208_s19 = int_to_ptr.vmem [resolvable:$false] %s4207_s19 }
 0x376   : > { %s4209_s28 = scalar_lea.vmem %s4208_s19, 512  ;;  %p4210_p0 = scmp.lt.s32.totalorder %s5085_s11, %s4208_s19 }
 0x377   : > { %p4205_p12 = pnand %p4204_p11, %p4404_p3  ;;  %p4211_p1 = scmp.lt.s32.totalorder %s4209_s28, %s4203_s23 }
 0x379   : > { %p4206_p13 = pneg %p4205_p12  ;;  %p4212_p2 = por %p4211_p1, %p4210_p0 }
 0x37b   : > { %p4213_p4 = pnand %p4212_p2, %p4206_p13 }
 0x37d   : > { %4216 = shalt.err (!%p4213_p4)
}
 0x37e   : > { %s4217_s29 = scalar_lea.hbm %s5082_s16, 256  ;;  %s4221_s0 = scalar_lea.hbm %s5149_s7, 512 }
 0x37f   : > { %p4218_p5 = scmp.ne.s32.totalorder %s5082_s16, %s4217_s29  ;;  %p4222_p8 = scmp.lt.u32.totalorder %s5082_s16, %s5149_s7 }
 0x380   : > { %p4223_p10 = scmp.lt.u32.totalorder %s4221_s0, %s4217_s29  ;;  %p4225_p12 = scmp.lt.u32.totalorder %s4217_s29, %s5082_s16 }
 0x381   : > { %p4219_p6 = pnand %p4218_p5, %p4404_p3 }
 0x382   : > { %p4224_p11 = por %p4223_p10, %p4222_p8 }
 0x383   : > { %p4220_p7 = pneg %p4219_p6 }
 0x384   : > { %p4226_p13 = por %p4225_p12, %p4224_p11 }
 0x386   : > { %p4227_p0 = pnand %p4226_p13, %p4220_p7 }
 0x388   : > { %4230 = shalt.err (!%p4227_p0)
}
 0x389   : > { %3654 = dma.vmem_to_hbm [thread:$0]  (%p4404_p3), %s5085_s11, 256, %s5082_s16, %s3174_s12, %s4311_s22, %s4312_s9, %s4313_s10  }
 0x38a PF: > { %p3664_p1 = scmp.ge.s32.totalorder %s4301_s8, 2  ;;  %s3216_s15 = sand.u32 1, %s4273_s24  }
 0x38b   : > { %s3217_s23 = scalar_lea.sflag [#allocation4], %s3216_s15 }
 0x38c   : > { %p3658_p2 = pnand %p3664_p1, %p4414_p9 }
 0x38e   : > { %4264 = dma.done.wait (!%p3658_p2), %s3217_s23, 256  }
 0x38f   : > { %4266 = vsyncadd (!%p3658_p2), %s3217_s23, 4294967040  ;;  %s3226_s13 = scalar_lea.sflag [#allocation6], %s3216_s15 }
 0x390   : > { %4268 = dma.done.wait (!%p3658_p2), %s3226_s13, 256  }
 0x391   : > { %4270 = vsyncadd (!%p3658_p2), %s3226_s13, 4294967040  ;;  %s24_s8 = sadd.s32 1, %s4301_s8   ;;  %s5161_s27 = sld [smem:[#allocation9_spill]] }
 0x392   : > { %p21_p4 = scmp.ge.s32.totalorder %s24_s8, 6   ;;  %s5162_s28 = sld [smem:[#allocation10_spill]] }
 0x393   : > { %s5163_s29 = sld [smem:[#allocation11_spill]]  ;;  %s5164_s30 = sld [smem:[#allocation12_spill]] }
 0x394   : > { %s5165_s24 = smov %s4277_s25  ;;  %s5166_s25 = smov %s4281_s26 }
 0x395   : > { %s5167_s26 = smov %s4422_s17  ;;  %23 = sbr.rel (!%p21_p4) target bundleno = 9 (0x9), region = 113 }
 0x39c   :  { %3231 = vsyncpa [#allocation4], 1 }
 0x39d   :  { %3233 = vsyncpa [#allocation4 + $0x1], 1 }
 0x39e   :  { %3234 = vsyncpa [#allocation6], 1 }
 0x39f   :  { %3236 = vsyncpa [#allocation6 + $0x1], 1 }

</bundles_post_ra>
